<compile_context>
chip_gen: v5e
topology: v5e:2x2
jax: 0.10.0
libtpu: 0.0.40
codegen_flags: <defaults>
</compile_context>

<pallas_src>
import jax
import jax.numpy as jnp
from jax.experimental import pallas as pl
from jax.experimental.pallas import tpu as pltpu

LANE = 128                     # one vreg lane-width per gate block
GATE_SRC = (0, 1, 3, 2)        # kernel block d <- torch gate GATE_SRC[d]; (i,f,o,g)


def _ceil8(n):
    return -(-n // 8) * 8


# ----------------------- Fused forward-pass kernel --------------------------
def build_forward(meta):
    """Returns a jitted forward(x, slab) using a single fused pallas_call."""
    F = meta["F"]             # total input features (player + team)
    M = meta["M"]             # merged mid width (player_MLP_hid + 2*team_hid)
    hidden = meta["hidden"]   # combined mid hidden size
    out_dim = meta["out_dim"] # player_input_size
    offs = meta["offs"]       # static row offsets into the parameter slab
    G = 4 * LANE              # padded gate width

    def kernel(x_ref, p_ref, out_ref):
        B, T, _ = x_ref.shape

        # Hoisted input projection: one MXU pass for all time steps.
        x2 = x_ref[...].reshape(B * T, F)
        gx = (jnp.dot(x2, p_ref[offs["wx"]:offs["wx"] + F, :],
                      preferred_element_type=jnp.float32)
              + p_ref[offs["b"]:offs["b"] + 1, :])
        # One-time transpose to time-major so the loop reads contiguous rows.
        gx = jnp.swapaxes(gx.reshape(B, T, G), 0, 1).reshape(T * B, G)

        wh = p_ref[offs["wh"]:offs["wh"] + LANE, :]          # (128, 512), zero-padded
        h = jnp.zeros((B, LANE), jnp.float32)                # padded lanes stay 0
        c = jnp.zeros((B, LANE), jnp.float32)

        # Serial recurrence, fully unrolled (T is small and static).
        # TODO(synk): for large T switch to lax.fori_loop(unroll=small) with gx
        #   staged in a VMEM scratch to bound live ranges.
        for t in range(T):
            gates = (gx[t * B:(t + 1) * B, :]
                     + jnp.dot(h, wh, preferred_element_type=jnp.float32))
            sig = jax.nn.sigmoid(gates[:, :3 * LANE])        # i, f, o in one pass
            g = jnp.tanh(gates[:, 3 * LANE:])
            c = sig[:, LANE:2 * LANE] * c + sig[:, :LANE] * g
            h = sig[:, 2 * LANE:3 * LANE] * jnp.tanh(c)

        # Merged "mid" heads (block-diagonal) == concat(player_out, team_out).
        combined = jnp.maximum(
            jnp.dot(h, p_ref[offs["wm"]:offs["wm"] + LANE, :M],
                    preferred_element_type=jnp.float32)
            + p_ref[offs["bm"]:offs["bm"] + 1, :M], 0.0)
        # Combined mid: Linear + ReLU.
        hid = jnp.maximum(
            jnp.dot(combined, p_ref[offs["cw"]:offs["cw"] + M, :hidden],
                    preferred_element_type=jnp.float32)
            + p_ref[offs["cb"]:offs["cb"] + 1, :hidden], 0.0)
        # Output head.
        out_ref[...] = (
            jnp.dot(hid, p_ref[offs["ow"]:offs["ow"] + hidden, :out_dim],
                    preferred_element_type=jnp.float32)
            + p_ref[offs["ob"]:offs["ob"] + 1, :out_dim])

    vmem = pl.BlockSpec(memory_space=pltpu.MemorySpace.VMEM)

    @jax.jit
    def forward(slab, x):
        B = x.shape[0]
        return pl.pallas_call(
            kernel,
            out_shape=jax.ShapeDtypeStruct((B, out_dim), jnp.float32),
            in_specs=[vmem, vmem],
            out_specs=vmem,
            compiler_params=pltpu.CompilerParams(
                vmem_limit_bytes=32 * 1024 * 1024),
        )(x, slab)

    return forward


# ------------------------------ Parameters ----------------------------------
def _uniform(key, shape, bound):
    return jax.random.uniform(key, shape, jnp.float32, -bound, bound)


def init_params(key, player_in, player_hid, player_mlp_hid,
                team_in, team_hid, hidden):
    """Per-branch parameters mirroring the PyTorch module (weights transposed)."""
    ks = jax.random.split(key, 16)
    kp = 1.0 / jnp.sqrt(player_hid)
    kt = 1.0 / jnp.sqrt(team_hid)
    return {
        # player LSTM: (in, 4H), (H, 4H), bias = b_ih + b_hh, gate order i,f,g,o
        "p_wx": _uniform(ks[0], (player_in, 4 * player_hid), kp),
        "p_wh": _uniform(ks[1], (player_hid, 4 * player_hid), kp),
        "p_b": (_uniform(ks[2], (1, 4 * player_hid), kp)
                + _uniform(ks[3], (1, 4 * player_hid), kp)),
        # player mid: Linear(player_hid -> player_mlp_hid) + ReLU
        "p_mid_w": _uniform(ks[4], (player_hid, player_mlp_hid), kp),
        "p_mid_b": _uniform(ks[5], (1, player_mlp_hid), kp),
        # team LSTM
        "t_wx": _uniform(ks[6], (team_in, 4 * team_hid), kt),
        "t_wh": _uniform(ks[7], (team_hid, 4 * team_hid), kt),
        "t_b": (_uniform(ks[8], (1, 4 * team_hid), kt)
                + _uniform(ks[9], (1, 4 * team_hid), kt)),
        # team mid: Linear(team_hid -> 2*team_hid) + ReLU
        "t_mid_w": _uniform(ks[10], (team_hid, 2 * team_hid), kt),
        "t_mid_b": _uniform(ks[11], (1, 2 * team_hid), kt),
        # combined mid: Linear(player_mlp_hid + 2*team_hid -> hidden) + ReLU
        "c_mid_w": _uniform(ks[12], (player_mlp_hid + 2 * team_hid, hidden),
                            1.0 / jnp.sqrt(player_mlp_hid + 2 * team_hid)),
        "c_mid_b": _uniform(ks[13], (1, hidden),
                            1.0 / jnp.sqrt(player_mlp_hid + 2 * team_hid)),
        # out: Linear(hidden -> player_in)
        "c_out_w": _uniform(ks[14], (hidden, player_in), 1.0 / jnp.sqrt(hidden)),
        "c_out_b": _uniform(ks[15], (1, player_in), 1.0 / jnp.sqrt(hidden)),
    }


def pack_params(params):
    """Pack all weights/biases into ONE lane-padded (rows, 512) f32 slab.

    * Player/team LSTMs are merged into a single block-diagonal LSTM over
      HC = Hp + Ht hidden units (gate math never mixes the halves, so the
      concatenated state evolves exactly like the two independent LSTMs).
    * Each gate block is padded to 128 lanes and the gates are laid out as
      (i, f, o, g) so the kernel slices only at 128-lane boundaries.
    * All padded entries are zero -> padded lanes of h/c stay exactly 0.
    """
    Fp, Ft = params["p_wx"].shape[0], params["t_wx"].shape[0]
    Hp, Ht = params["p_wh"].shape[0], params["t_wh"].shape[0]
    Mp, Mt = params["p_mid_w"].shape[1], params["t_mid_w"].shape[1]
    hidden = params["c_mid_w"].shape[1]
    out_dim = params["c_out_w"].shape[1]
    F, HC, M = Fp + Ft, Hp + Ht, Mp + Mt
    assert HC <= LANE and M <= 4 * LANE and hidden <= 4 * LANE
    G = 4 * LANE

    def gate_pack(wp, wt, rows):
        rp, rt = wp.shape[0], wt.shape[0]
        out = jnp.zeros((rows, G), jnp.float32)
        for d, s in enumerate(GATE_SRC):      # dst block d <- torch gate s
            out = out.at[:rp, d * LANE:d * LANE + Hp].set(wp[:, s * Hp:(s + 1) * Hp])
            out = out.at[rp:rp + rt, d * LANE + Hp:d * LANE + HC].set(
                wt[:, s * Ht:(s + 1) * Ht])
        return out

    wx = gate_pack(params["p_wx"], params["t_wx"], F)        # (F, 512)
    wh = gate_pack(params["p_wh"], params["t_wh"], LANE)     # (128, 512)

    b = jnp.zeros((1, G), jnp.float32)
    for d, s in enumerate(GATE_SRC):
        b = b.at[:, d * LANE:d * LANE + Hp].set(params["p_b"][:, s * Hp:(s + 1) * Hp])
        b = b.at[:, d * LANE + Hp:d * LANE + HC].set(
            params["t_b"][:, s * Ht:(s + 1) * Ht])

    # Block-diagonal merge of the two mid heads (rows padded to 128 to match
    # the padded hidden state).
    w_mid = jnp.zeros((LANE, M), jnp.float32)
    w_mid = w_mid.at[:Hp, :Mp].set(params["p_mid_w"])
    w_mid = w_mid.at[Hp:HC, Mp:].set(params["t_mid_w"])
    b_mid = jnp.concatenate([params["p_mid_b"], params["t_mid_b"]], axis=1)

    # --- assemble the single parameter slab (all segments 8-row aligned) ----
    offs, rows = {}, 0

    def reserve(name, r):
        nonlocal rows
        offs[name] = rows
        rows += _ceil8(r)

    reserve("wx", F)
    reserve("wh", LANE)
    reserve("b", 1)
    reserve("wm", LANE)
    reserve("bm", 1)
    reserve("cw", M)
    reserve("cb", 1)
    reserve("ow", hidden)
    reserve("ob", 1)

    slab = jnp.zeros((rows, G), jnp.float32)
    slab = slab.at[offs["wx"]:offs["wx"] + F, :].set(wx)
    slab = slab.at[offs["wh"]:offs["wh"] + LANE, :].set(wh)
    slab = slab.at[offs["b"]:offs["b"] + 1, :].set(b)
    slab = slab.at[offs["wm"]:offs["wm"] + LANE, :M].set(w_mid)
    slab = slab.at[offs["bm"]:offs["bm"] + 1, :M].set(b_mid)
    slab = slab.at[offs["cw"]:offs["cw"] + M, :hidden].set(params["c_mid_w"])
    slab = slab.at[offs["cb"]:offs["cb"] + 1, :hidden].set(params["c_mid_b"])
    slab = slab.at[offs["ow"]:offs["ow"] + hidden, :out_dim].set(params["c_out_w"])
    slab = slab.at[offs["ob"]:offs["ob"] + 1, :out_dim].set(params["c_out_b"])

    meta = {"F": F, "M": M, "hidden": hidden, "out_dim": out_dim, "offs": offs}
    return slab, meta


# ------------------------------ Pure-JAX reference ---------------------------
def _lstm_ref(x, wx, wh, b):
    B, T, D = x.shape
    H = wh.shape[0]

    def step(carry, xt):
        h, c = carry
        gates = xt @ wx + h @ wh + b[0]
        i = jax.nn.sigmoid(gates[:, :H])
        f = jax.nn.sigmoid(gates[:, H:2 * H])
        g = jnp.tanh(gates[:, 2 * H:3 * H])
        o = jax.nn.sigmoid(gates[:, 3 * H:])
        c = f * c + i * g
        h = o * jnp.tanh(c)
        return (h, c), None

    (h, _), _ = jax.lax.scan(
        step, (jnp.zeros((B, H), jnp.float32), jnp.zeros((B, H), jnp.float32)),
        jnp.transpose(x, (1, 0, 2)))
    return h


def _forward_ref(params, x, player_input_size):
    player_x = x[:, :, :player_input_size]
    team_x = x[:, :, player_input_size:]
    p_h = _lstm_ref(player_x, params["p_wx"], params["p_wh"], params["p_b"])
    p_out = jnp.maximum(p_h @ params["p_mid_w"] + params["p_mid_b"], 0.0)
    t_h = _lstm_ref(team_x, params["t_wx"], params["t_wh"], params["t_b"])
    t_out = jnp.maximum(t_h @ params["t_mid_w"] + params["t_mid_b"], 0.0)
    combined = jnp.concatenate([p_out, t_out], axis=-1)
    hid = jnp.maximum(combined @ params["c_mid_w"] + params["c_mid_b"], 0.0)
    return hid @ params["c_out_w"] + params["c_out_b"]


# --------------------------------- Main --------------------------------------
if __name__ == "__main__":
    # Small, forward-consistent sizes.
    player_input_size = 6
    player_hidden_size = 16
    player_MLP_hidden_size = 12
    team_input_size = 5
    team_hidden_size = 10
    hidden_size = 32
    B, T = 2, 8

    key = jax.random.PRNGKey(0)
    k_params, k_x = jax.random.split(key)
    params = init_params(k_params, player_input_size, player_hidden_size,
                         player_MLP_hidden_size, team_input_size,
                         team_hidden_size, hidden_size)
    slab, meta = pack_params(params)
    forward = build_forward(meta)

    x = jax.random.normal(
        k_x, (B, T, player_input_size + team_input_size), jnp.float32)

    out = jax.block_until_ready(forward(slab, x))

    ref = _forward_ref(params, x, player_input_size)
    assert out.shape == (B, player_input_size), out.shape
    assert jnp.allclose(out, ref, atol=1e-4, rtol=1e-4), (
        float(jnp.max(jnp.abs(out - ref))))

    print("KERNEL_OK")
</pallas_src>

<mosaic_0001>
module attributes {stable_mosaic.version = 11 : i64} {
  func.func @kernel(%arg0: memref<2x8x11xf32, #tpu.memory_space<vmem>>, %arg1: memref<368x512xf32, #tpu.memory_space<vmem>>, %arg2: memref<2x6xf32, #tpu.memory_space<vmem>>) attributes {dimension_semantics = [], scalar_prefetch = 0 : i64, scratch_operands = 0 : i64, tpu.core_type = #tpu.core_type<tc>} {
    %c0 = arith.constant 0 : index
    %c0_0 = arith.constant 0 : index
    %c0_1 = arith.constant 0 : index
    %0 = vector.load %arg0[%c0, %c0_0, %c0_1] : memref<2x8x11xf32, #tpu.memory_space<vmem>>, vector<2x8x11xf32>
    %1 = vector.shape_cast %0 : vector<2x8x11xf32> to vector<16x11xf32>
    %c0_2 = arith.constant 0 : index
    %c0_3 = arith.constant 0 : index
    %2 = vector.load %arg1[%c0_2, %c0_3] : memref<368x512xf32, #tpu.memory_space<vmem>>, vector<11x512xf32>
    %cst = arith.constant dense<0.000000e+00> : vector<16x512xf32>
    %3 = tpu.matmul %1, %2, %cst {dimension_numbers = #tpu.dot_dimension_numbers<[1], [0], [0], [1], [0, 0, 1, 1], [], []>} : vector<16x11xf32>, vector<11x512xf32>, vector<16x512xf32> -> vector<16x512xf32>
    %c144 = arith.constant 144 : index
    %c0_4 = arith.constant 0 : index
    %4 = vector.load %arg1[%c144, %c0_4] : memref<368x512xf32, #tpu.memory_space<vmem>>, vector<1x512xf32>
    %5 = vector.broadcast %4 : vector<1x512xf32> to vector<16x512xf32>
    %6 = arith.addf %3, %5 : vector<16x512xf32>
    %7 = vector.shape_cast %6 : vector<16x512xf32> to vector<2x8x512xf32>
    %8 = tpu.transpose %7, [1, 0, 2] : vector<2x8x512xf32> -> vector<8x2x512xf32>
    %9 = vector.shape_cast %8 : vector<8x2x512xf32> to vector<16x512xf32>
    %c16 = arith.constant 16 : index
    %c0_5 = arith.constant 0 : index
    %10 = vector.load %arg1[%c16, %c0_5] : memref<368x512xf32, #tpu.memory_space<vmem>>, vector<128x512xf32>
    %cst_6 = arith.constant 0.000000e+00 : f32
    %11 = vector.broadcast %cst_6 : f32 to vector<2x128xf32>
    %cst_7 = arith.constant 0.000000e+00 : f32
    %12 = vector.broadcast %cst_7 : f32 to vector<2x128xf32>
    %13 = vector.extract_strided_slice %9 {offsets = [0, 0], sizes = [2, 512], strides = [1, 1]} : vector<16x512xf32> to vector<2x512xf32>
    %cst_8 = arith.constant dense<0.000000e+00> : vector<2x512xf32>
    %14 = tpu.matmul %11, %10, %cst_8 {dimension_numbers = #tpu.dot_dimension_numbers<[1], [0], [0], [1], [0, 0, 1, 1], [], []>} : vector<2x128xf32>, vector<128x512xf32>, vector<2x512xf32> -> vector<2x512xf32>
    %15 = arith.addf %13, %14 : vector<2x512xf32>
    %16 = vector.extract_strided_slice %15 {offsets = [0, 0], sizes = [2, 384], strides = [1, 1]} : vector<2x512xf32> to vector<2x384xf32>
    %17 = arith.negf %16 : vector<2x384xf32>
    %18 = math.exp %17 : vector<2x384xf32>
    %cst_9 = arith.constant 1.000000e+00 : f32
    %19 = vector.broadcast %cst_9 : f32 to vector<2x384xf32>
    %20 = arith.addf %19, %18 : vector<2x384xf32>
    %21 = arith.divf %19, %20 : vector<2x384xf32>
    %22 = vector.extract_strided_slice %15 {offsets = [0, 384], sizes = [2, 128], strides = [1, 1]} : vector<2x512xf32> to vector<2x128xf32>
    %23 = math.tanh %22 : vector<2x128xf32>
    %24 = vector.extract_strided_slice %21 {offsets = [0, 128], sizes = [2, 128], strides = [1, 1]} : vector<2x384xf32> to vector<2x128xf32>
    %25 = arith.mulf %24, %12 : vector<2x128xf32>
    %26 = vector.extract_strided_slice %21 {offsets = [0, 0], sizes = [2, 128], strides = [1, 1]} : vector<2x384xf32> to vector<2x128xf32>
    %27 = arith.mulf %26, %23 : vector<2x128xf32>
    %28 = arith.addf %25, %27 : vector<2x128xf32>
    %29 = vector.extract_strided_slice %21 {offsets = [0, 256], sizes = [2, 128], strides = [1, 1]} : vector<2x384xf32> to vector<2x128xf32>
    %30 = math.tanh %28 : vector<2x128xf32>
    %31 = arith.mulf %29, %30 : vector<2x128xf32>
    %32 = vector.extract_strided_slice %9 {offsets = [2, 0], sizes = [2, 512], strides = [1, 1]} : vector<16x512xf32> to vector<2x512xf32>
    %cst_10 = arith.constant dense<0.000000e+00> : vector<2x512xf32>
    %33 = tpu.matmul %31, %10, %cst_10 {dimension_numbers = #tpu.dot_dimension_numbers<[1], [0], [0], [1], [0, 0, 1, 1], [], []>} : vector<2x128xf32>, vector<128x512xf32>, vector<2x512xf32> -> vector<2x512xf32>
    %34 = arith.addf %32, %33 : vector<2x512xf32>
    %35 = vector.extract_strided_slice %34 {offsets = [0, 0], sizes = [2, 384], strides = [1, 1]} : vector<2x512xf32> to vector<2x384xf32>
    %36 = arith.negf %35 : vector<2x384xf32>
    %37 = math.exp %36 : vector<2x384xf32>
    %cst_11 = arith.constant 1.000000e+00 : f32
    %38 = vector.broadcast %cst_11 : f32 to vector<2x384xf32>
    %39 = arith.addf %38, %37 : vector<2x384xf32>
    %40 = arith.divf %38, %39 : vector<2x384xf32>
    %41 = vector.extract_strided_slice %34 {offsets = [0, 384], sizes = [2, 128], strides = [1, 1]} : vector<2x512xf32> to vector<2x128xf32>
    %42 = math.tanh %41 : vector<2x128xf32>
    %43 = vector.extract_strided_slice %40 {offsets = [0, 128], sizes = [2, 128], strides = [1, 1]} : vector<2x384xf32> to vector<2x128xf32>
    %44 = arith.mulf %43, %28 : vector<2x128xf32>
    %45 = vector.extract_strided_slice %40 {offsets = [0, 0], sizes = [2, 128], strides = [1, 1]} : vector<2x384xf32> to vector<2x128xf32>
    %46 = arith.mulf %45, %42 : vector<2x128xf32>
    %47 = arith.addf %44, %46 : vector<2x128xf32>
    %48 = vector.extract_strided_slice %40 {offsets = [0, 256], sizes = [2, 128], strides = [1, 1]} : vector<2x384xf32> to vector<2x128xf32>
    %49 = math.tanh %47 : vector<2x128xf32>
    %50 = arith.mulf %48, %49 : vector<2x128xf32>
    %51 = vector.extract_strided_slice %9 {offsets = [4, 0], sizes = [2, 512], strides = [1, 1]} : vector<16x512xf32> to vector<2x512xf32>
    %cst_12 = arith.constant dense<0.000000e+00> : vector<2x512xf32>
    %52 = tpu.matmul %50, %10, %cst_12 {dimension_numbers = #tpu.dot_dimension_numbers<[1], [0], [0], [1], [0, 0, 1, 1], [], []>} : vector<2x128xf32>, vector<128x512xf32>, vector<2x512xf32> -> vector<2x512xf32>
    %53 = arith.addf %51, %52 : vector<2x512xf32>
    %54 = vector.extract_strided_slice %53 {offsets = [0, 0], sizes = [2, 384], strides = [1, 1]} : vector<2x512xf32> to vector<2x384xf32>
    %55 = arith.negf %54 : vector<2x384xf32>
    %56 = math.exp %55 : vector<2x384xf32>
    %cst_13 = arith.constant 1.000000e+00 : f32
    %57 = vector.broadcast %cst_13 : f32 to vector<2x384xf32>
    %58 = arith.addf %57, %56 : vector<2x384xf32>
    %59 = arith.divf %57, %58 : vector<2x384xf32>
    %60 = vector.extract_strided_slice %53 {offsets = [0, 384], sizes = [2, 128], strides = [1, 1]} : vector<2x512xf32> to vector<2x128xf32>
    %61 = math.tanh %60 : vector<2x128xf32>
    %62 = vector.extract_strided_slice %59 {offsets = [0, 128], sizes = [2, 128], strides = [1, 1]} : vector<2x384xf32> to vector<2x128xf32>
    %63 = arith.mulf %62, %47 : vector<2x128xf32>
    %64 = vector.extract_strided_slice %59 {offsets = [0, 0], sizes = [2, 128], strides = [1, 1]} : vector<2x384xf32> to vector<2x128xf32>
    %65 = arith.mulf %64, %61 : vector<2x128xf32>
    %66 = arith.addf %63, %65 : vector<2x128xf32>
    %67 = vector.extract_strided_slice %59 {offsets = [0, 256], sizes = [2, 128], strides = [1, 1]} : vector<2x384xf32> to vector<2x128xf32>
    %68 = math.tanh %66 : vector<2x128xf32>
    %69 = arith.mulf %67, %68 : vector<2x128xf32>
    %70 = vector.extract_strided_slice %9 {offsets = [6, 0], sizes = [2, 512], strides = [1, 1]} : vector<16x512xf32> to vector<2x512xf32>
    %cst_14 = arith.constant dense<0.000000e+00> : vector<2x512xf32>
    %71 = tpu.matmul %69, %10, %cst_14 {dimension_numbers = #tpu.dot_dimension_numbers<[1], [0], [0], [1], [0, 0, 1, 1], [], []>} : vector<2x128xf32>, vector<128x512xf32>, vector<2x512xf32> -> vector<2x512xf32>
    %72 = arith.addf %70, %71 : vector<2x512xf32>
    %73 = vector.extract_strided_slice %72 {offsets = [0, 0], sizes = [2, 384], strides = [1, 1]} : vector<2x512xf32> to vector<2x384xf32>
    %74 = arith.negf %73 : vector<2x384xf32>
    %75 = math.exp %74 : vector<2x384xf32>
    %cst_15 = arith.constant 1.000000e+00 : f32
    %76 = vector.broadcast %cst_15 : f32 to vector<2x384xf32>
    %77 = arith.addf %76, %75 : vector<2x384xf32>
    %78 = arith.divf %76, %77 : vector<2x384xf32>
    %79 = vector.extract_strided_slice %72 {offsets = [0, 384], sizes = [2, 128], strides = [1, 1]} : vector<2x512xf32> to vector<2x128xf32>
    %80 = math.tanh %79 : vector<2x128xf32>
    %81 = vector.extract_strided_slice %78 {offsets = [0, 128], sizes = [2, 128], strides = [1, 1]} : vector<2x384xf32> to vector<2x128xf32>
    %82 = arith.mulf %81, %66 : vector<2x128xf32>
    %83 = vector.extract_strided_slice %78 {offsets = [0, 0], sizes = [2, 128], strides = [1, 1]} : vector<2x384xf32> to vector<2x128xf32>
    %84 = arith.mulf %83, %80 : vector<2x128xf32>
    %85 = arith.addf %82, %84 : vector<2x128xf32>
    %86 = vector.extract_strided_slice %78 {offsets = [0, 256], sizes = [2, 128], strides = [1, 1]} : vector<2x384xf32> to vector<2x128xf32>
    %87 = math.tanh %85 : vector<2x128xf32>
    %88 = arith.mulf %86, %87 : vector<2x128xf32>
    %89 = vector.extract_strided_slice %9 {offsets = [8, 0], sizes = [2, 512], strides = [1, 1]} : vector<16x512xf32> to vector<2x512xf32>
    %cst_16 = arith.constant dense<0.000000e+00> : vector<2x512xf32>
    %90 = tpu.matmul %88, %10, %cst_16 {dimension_numbers = #tpu.dot_dimension_numbers<[1], [0], [0], [1], [0, 0, 1, 1], [], []>} : vector<2x128xf32>, vector<128x512xf32>, vector<2x512xf32> -> vector<2x512xf32>
    %91 = arith.addf %89, %90 : vector<2x512xf32>
    %92 = vector.extract_strided_slice %91 {offsets = [0, 0], sizes = [2, 384], strides = [1, 1]} : vector<2x512xf32> to vector<2x384xf32>
    %93 = arith.negf %92 : vector<2x384xf32>
    %94 = math.exp %93 : vector<2x384xf32>
    %cst_17 = arith.constant 1.000000e+00 : f32
    %95 = vector.broadcast %cst_17 : f32 to vector<2x384xf32>
    %96 = arith.addf %95, %94 : vector<2x384xf32>
    %97 = arith.divf %95, %96 : vector<2x384xf32>
    %98 = vector.extract_strided_slice %91 {offsets = [0, 384], sizes = [2, 128], strides = [1, 1]} : vector<2x512xf32> to vector<2x128xf32>
    %99 = math.tanh %98 : vector<2x128xf32>
    %100 = vector.extract_strided_slice %97 {offsets = [0, 128], sizes = [2, 128], strides = [1, 1]} : vector<2x384xf32> to vector<2x128xf32>
    %101 = arith.mulf %100, %85 : vector<2x128xf32>
    %102 = vector.extract_strided_slice %97 {offsets = [0, 0], sizes = [2, 128], strides = [1, 1]} : vector<2x384xf32> to vector<2x128xf32>
    %103 = arith.mulf %102, %99 : vector<2x128xf32>
    %104 = arith.addf %101, %103 : vector<2x128xf32>
    %105 = vector.extract_strided_slice %97 {offsets = [0, 256], sizes = [2, 128], strides = [1, 1]} : vector<2x384xf32> to vector<2x128xf32>
    %106 = math.tanh %104 : vector<2x128xf32>
    %107 = arith.mulf %105, %106 : vector<2x128xf32>
    %108 = vector.extract_strided_slice %9 {offsets = [10, 0], sizes = [2, 512], strides = [1, 1]} : vector<16x512xf32> to vector<2x512xf32>
    %cst_18 = arith.constant dense<0.000000e+00> : vector<2x512xf32>
    %109 = tpu.matmul %107, %10, %cst_18 {dimension_numbers = #tpu.dot_dimension_numbers<[1], [0], [0], [1], [0, 0, 1, 1], [], []>} : vector<2x128xf32>, vector<128x512xf32>, vector<2x512xf32> -> vector<2x512xf32>
    %110 = arith.addf %108, %109 : vector<2x512xf32>
    %111 = vector.extract_strided_slice %110 {offsets = [0, 0], sizes = [2, 384], strides = [1, 1]} : vector<2x512xf32> to vector<2x384xf32>
    %112 = arith.negf %111 : vector<2x384xf32>
    %113 = math.exp %112 : vector<2x384xf32>
    %cst_19 = arith.constant 1.000000e+00 : f32
    %114 = vector.broadcast %cst_19 : f32 to vector<2x384xf32>
    %115 = arith.addf %114, %113 : vector<2x384xf32>
    %116 = arith.divf %114, %115 : vector<2x384xf32>
    %117 = vector.extract_strided_slice %110 {offsets = [0, 384], sizes = [2, 128], strides = [1, 1]} : vector<2x512xf32> to vector<2x128xf32>
    %118 = math.tanh %117 : vector<2x128xf32>
    %119 = vector.extract_strided_slice %116 {offsets = [0, 128], sizes = [2, 128], strides = [1, 1]} : vector<2x384xf32> to vector<2x128xf32>
    %120 = arith.mulf %119, %104 : vector<2x128xf32>
    %121 = vector.extract_strided_slice %116 {offsets = [0, 0], sizes = [2, 128], strides = [1, 1]} : vector<2x384xf32> to vector<2x128xf32>
    %122 = arith.mulf %121, %118 : vector<2x128xf32>
    %123 = arith.addf %120, %122 : vector<2x128xf32>
    %124 = vector.extract_strided_slice %116 {offsets = [0, 256], sizes = [2, 128], strides = [1, 1]} : vector<2x384xf32> to vector<2x128xf32>
    %125 = math.tanh %123 : vector<2x128xf32>
    %126 = arith.mulf %124, %125 : vector<2x128xf32>
    %127 = vector.extract_strided_slice %9 {offsets = [12, 0], sizes = [2, 512], strides = [1, 1]} : vector<16x512xf32> to vector<2x512xf32>
    %cst_20 = arith.constant dense<0.000000e+00> : vector<2x512xf32>
    %128 = tpu.matmul %126, %10, %cst_20 {dimension_numbers = #tpu.dot_dimension_numbers<[1], [0], [0], [1], [0, 0, 1, 1], [], []>} : vector<2x128xf32>, vector<128x512xf32>, vector<2x512xf32> -> vector<2x512xf32>
    %129 = arith.addf %127, %128 : vector<2x512xf32>
    %130 = vector.extract_strided_slice %129 {offsets = [0, 0], sizes = [2, 384], strides = [1, 1]} : vector<2x512xf32> to vector<2x384xf32>
    %131 = arith.negf %130 : vector<2x384xf32>
    %132 = math.exp %131 : vector<2x384xf32>
    %cst_21 = arith.constant 1.000000e+00 : f32
    %133 = vector.broadcast %cst_21 : f32 to vector<2x384xf32>
    %134 = arith.addf %133, %132 : vector<2x384xf32>
    %135 = arith.divf %133, %134 : vector<2x384xf32>
    %136 = vector.extract_strided_slice %129 {offsets = [0, 384], sizes = [2, 128], strides = [1, 1]} : vector<2x512xf32> to vector<2x128xf32>
    %137 = math.tanh %136 : vector<2x128xf32>
    %138 = vector.extract_strided_slice %135 {offsets = [0, 128], sizes = [2, 128], strides = [1, 1]} : vector<2x384xf32> to vector<2x128xf32>
    %139 = arith.mulf %138, %123 : vector<2x128xf32>
    %140 = vector.extract_strided_slice %135 {offsets = [0, 0], sizes = [2, 128], strides = [1, 1]} : vector<2x384xf32> to vector<2x128xf32>
    %141 = arith.mulf %140, %137 : vector<2x128xf32>
    %142 = arith.addf %139, %141 : vector<2x128xf32>
    %143 = vector.extract_strided_slice %135 {offsets = [0, 256], sizes = [2, 128], strides = [1, 1]} : vector<2x384xf32> to vector<2x128xf32>
    %144 = math.tanh %142 : vector<2x128xf32>
    %145 = arith.mulf %143, %144 : vector<2x128xf32>
    %146 = vector.extract_strided_slice %9 {offsets = [14, 0], sizes = [2, 512], strides = [1, 1]} : vector<16x512xf32> to vector<2x512xf32>
    %cst_22 = arith.constant dense<0.000000e+00> : vector<2x512xf32>
    %147 = tpu.matmul %145, %10, %cst_22 {dimension_numbers = #tpu.dot_dimension_numbers<[1], [0], [0], [1], [0, 0, 1, 1], [], []>} : vector<2x128xf32>, vector<128x512xf32>, vector<2x512xf32> -> vector<2x512xf32>
    %148 = arith.addf %146, %147 : vector<2x512xf32>
    %149 = vector.extract_strided_slice %148 {offsets = [0, 0], sizes = [2, 384], strides = [1, 1]} : vector<2x512xf32> to vector<2x384xf32>
    %150 = arith.negf %149 : vector<2x384xf32>
    %151 = math.exp %150 : vector<2x384xf32>
    %cst_23 = arith.constant 1.000000e+00 : f32
    %152 = vector.broadcast %cst_23 : f32 to vector<2x384xf32>
    %153 = arith.addf %152, %151 : vector<2x384xf32>
    %154 = arith.divf %152, %153 : vector<2x384xf32>
    %155 = vector.extract_strided_slice %148 {offsets = [0, 384], sizes = [2, 128], strides = [1, 1]} : vector<2x512xf32> to vector<2x128xf32>
    %156 = math.tanh %155 : vector<2x128xf32>
    %157 = vector.extract_strided_slice %154 {offsets = [0, 128], sizes = [2, 128], strides = [1, 1]} : vector<2x384xf32> to vector<2x128xf32>
    %158 = arith.mulf %157, %142 : vector<2x128xf32>
    %159 = vector.extract_strided_slice %154 {offsets = [0, 0], sizes = [2, 128], strides = [1, 1]} : vector<2x384xf32> to vector<2x128xf32>
    %160 = arith.mulf %159, %156 : vector<2x128xf32>
    %161 = arith.addf %158, %160 : vector<2x128xf32>
    %162 = vector.extract_strided_slice %154 {offsets = [0, 256], sizes = [2, 128], strides = [1, 1]} : vector<2x384xf32> to vector<2x128xf32>
    %163 = math.tanh %161 : vector<2x128xf32>
    %164 = arith.mulf %162, %163 : vector<2x128xf32>
    %c152 = arith.constant 152 : index
    %c0_24 = arith.constant 0 : index
    %165 = vector.load %arg1[%c152, %c0_24] : memref<368x512xf32, #tpu.memory_space<vmem>>, vector<128x32xf32>
    %cst_25 = arith.constant dense<0.000000e+00> : vector<2x32xf32>
    %166 = tpu.matmul %164, %165, %cst_25 {dimension_numbers = #tpu.dot_dimension_numbers<[1], [0], [0], [1], [0, 0, 1, 1], [], []>} : vector<2x128xf32>, vector<128x32xf32>, vector<2x32xf32> -> vector<2x32xf32>
    %c280 = arith.constant 280 : index
    %c0_26 = arith.constant 0 : index
    %167 = vector.load %arg1[%c280, %c0_26] : memref<368x512xf32, #tpu.memory_space<vmem>>, vector<1x32xf32>
    %168 = vector.broadcast %167 : vector<1x32xf32> to vector<2x32xf32>
    %169 = arith.addf %166, %168 : vector<2x32xf32>
    %cst_27 = arith.constant 0.000000e+00 : f32
    %170 = vector.broadcast %cst_27 : f32 to vector<2x32xf32>
    %171 = arith.maximumf %169, %170 : vector<2x32xf32>
    %c288 = arith.constant 288 : index
    %c0_28 = arith.constant 0 : index
    %172 = vector.load %arg1[%c288, %c0_28] : memref<368x512xf32, #tpu.memory_space<vmem>>, vector<32x32xf32>
    %cst_29 = arith.constant dense<0.000000e+00> : vector<2x32xf32>
    %173 = tpu.matmul %171, %172, %cst_29 {dimension_numbers = #tpu.dot_dimension_numbers<[1], [0], [0], [1], [0, 0, 1, 1], [], []>} : vector<2x32xf32>, vector<32x32xf32>, vector<2x32xf32> -> vector<2x32xf32>
    %c320 = arith.constant 320 : index
    %c0_30 = arith.constant 0 : index
    %174 = vector.load %arg1[%c320, %c0_30] : memref<368x512xf32, #tpu.memory_space<vmem>>, vector<1x32xf32>
    %175 = vector.broadcast %174 : vector<1x32xf32> to vector<2x32xf32>
    %176 = arith.addf %173, %175 : vector<2x32xf32>
    %cst_31 = arith.constant 0.000000e+00 : f32
    %177 = vector.broadcast %cst_31 : f32 to vector<2x32xf32>
    %178 = arith.maximumf %176, %177 : vector<2x32xf32>
    %c328 = arith.constant 328 : index
    %c0_32 = arith.constant 0 : index
    %179 = vector.load %arg1[%c328, %c0_32] : memref<368x512xf32, #tpu.memory_space<vmem>>, vector<32x6xf32>
    %cst_33 = arith.constant dense<0.000000e+00> : vector<2x6xf32>
    %180 = tpu.matmul %178, %179, %cst_33 {dimension_numbers = #tpu.dot_dimension_numbers<[1], [0], [0], [1], [0, 0, 1, 1], [], []>} : vector<2x32xf32>, vector<32x6xf32>, vector<2x6xf32> -> vector<2x6xf32>
    %c360 = arith.constant 360 : index
    %c0_34 = arith.constant 0 : index
    %181 = vector.load %arg1[%c360, %c0_34] : memref<368x512xf32, #tpu.memory_space<vmem>>, vector<1x6xf32>
    %182 = vector.broadcast %181 : vector<1x6xf32> to vector<2x6xf32>
    %183 = arith.addf %180, %182 : vector<2x6xf32>
    %c0_35 = arith.constant 0 : index
    %c0_36 = arith.constant 0 : index
    %184 = vector.load %arg2[%c0_35, %c0_36] : memref<2x6xf32, #tpu.memory_space<vmem>>, vector<2x6xf32>
    tpu.vector_store %arg2[%c0_35, %c0_36], %183 {strides = array<i32>} : memref<2x6xf32, #tpu.memory_space<vmem>>, vector<2x6xf32>,
    return
  }
}

</mosaic_0001>

<bundles_post_ra>
// kernel: forward.1
= control target key start
LH: loop header
LB: loop body
LE: loop exit
PB: predicated region body
PF: predicated region fallthrough
CT: control target
= control target key end

     0   :  { %7 = vsyncpa [#allocation3], 0  ;;  %s2654_s0 = inlined_call_operand.hbm [shape: f32[2,8,11], index: 0, kind: input, shape index: {}]   ;;  %s2655_s1 = inlined_call_operand.hbm [shape: f32[368,512], index: 1, kind: input, shape index: {}]   ;;  %s2656_s2 = inlined_call_operand.hbm [shape: f32[2,6], index: 2, kind: output, shape index: {}]  }
   0x1   :  { %8 = vsyncpa [#allocation6], 0 }
   0x2   :  { %9 = vsyncpa [#allocation4], 0  ;;  %s14_s11 = sshll.u32 %s2654_s0, 4  ;;  %s1717_s12 = smov [#allocation2]   ;;  %s15_s11 = int_to_ptr.hbm [resolvable:$true] %s14_s11 }
   0x3   :  { %s16_s13 = sshll.u32 %s1717_s12, 4  ;;  %s27_s16 = sshll.u32 %s2655_s1, 4  ;;  %s17_s13 = int_to_ptr.vmem [resolvable:$true] %s16_s13  ;;  %s28_s16 = int_to_ptr.hbm [resolvable:$true] %s27_s16 }
   0x4   :  { %s1718_s17 = smov 128   ;;  %s1719_s18 = smov 8  }
   0x5   :  { %22 = dma.hbm_to_vmem [thread:$0]  %s15_s11, 256, %s17_s13, [#allocation3], %s1718_s17, %s1718_s17, %s1719_s18  }
   0x6   :  { %s1720_s19 = smov [#allocation5]   ;;  %s1721_s21 = smov 512  }
   0x7   :  { %s29_s20 = sshll.u32 %s1720_s19, 4  ;;  %s1722_s22 = smov 32   ;;  %s30_s20 = int_to_ptr.vmem [resolvable:$true] %s29_s20 }
   0x8   :  { %35 = dma.hbm_to_vmem [thread:$0]  %s28_s16, 23552, %s30_s20, [#allocation6], %s1721_s21, %s1721_s21, %s1722_s22  }
   0x9   :  { %1711 = dma.done.wait [#allocation3], 256  }
   0xa   :  { %1712 = vsyncadd [#allocation3], 4294967040 }
   0xb   :  { %1713 = dma.done.wait [#allocation6], 23552  }
   0xc   :  { %1714 = vsyncadd [#allocation6], 4294943744  ;;  %vm72_vm0 = vcmask 1042432   ;;  %v50_v0 = vld [vmem:[#allocation5 + $0x20] sm:$0x7]  ;;  %v1748_v2 = vld [vmem:[#allocation2] sm:$0xff] }
   0xd   :  { %v46_v1 = vld [vmem:[#allocation5] sm:$0xff]  ;;  %1480 = vmatpush.msk.msra.mxu3 %vm72_vm0, %v50_v0  ;;  %vm65_vm1 = vcmask 89088   ;;  %v52_v3 = vld [vmem:[#allocation5 + $0x30] sm:$0x7]  ;;  %v53_v5 = vld [vmem:[#allocation5 + $0x38] sm:$0x7] }
   0xe   :  { %v48_v4 = vld [vmem:[#allocation5 + $0x10] sm:$0xff]  ;;  %1486 = vmatpush.msk.msra.mxu2 %vm72_vm0, %v52_v3  ;;  %v51_v6 = vld [vmem:[#allocation5 + $0x28] sm:$0x7]  ;;  %v49_v9 = vld [vmem:[#allocation5 + $0x18] sm:$0xff]  ;;  %vm193_vm2 = vcmask 1045508   ;;  %vm197_vm3 = vcmask 1043458  }
   0xf   :  { %v1751_v7 = vld [vmem:[#allocation5 + $0x230] sm:$0xff]  ;;  %100 = vmatpush.msra.mxu3 %v46_v1  ;;  %1483 = vmatpush.msk.msra.mxu1 %vm72_vm0, %v51_v6  ;;  %v47_v8 = vld [vmem:[#allocation5 + $0x8] sm:$0xff]  ;;  %v1760_v11 = vld [vmem:[#allocation5 + $0x238] sm:$0xff]  ;;  %vm199_vm4 = vcmask 1045504   ;;  %vm195_vm5 = vcmask 1043456   ;;  %vm201_vm6 = vcmask 1045506  }
  0x10   :  { %1481 = vmatmul.msk.f32.vlgmr.msra.gmra.mxu3 %vm65_vm1, %v1748_v2  ;;  %146 = vmatpush.msra.mxu2 %v48_v4  ;;  %v1756_v10 = vld [vmem:[#allocation5 + $0x210] sm:$0xff]  ;;  %v1764_v13 = vld [vmem:[#allocation5 + $0x228] sm:$0xff]  ;;  %v1769_v14 = vld [vmem:[#allocation5 + $0x218] sm:$0xff]  ;;  %vm191_vm7 = vcmask 1041408   ;;  %vm236_vm8 = vcmask 1047556   ;;  %s1725_s0 = smov [#allocation7]  }
  0x11   :  { %1489 = vmatpush.msk.msrb.mxu3 %vm72_vm0, %v53_v5  ;;  %123 = vmatpush.msra.mxu1 %v47_v8  ;;  %v1762_v12 = vld [vmem:[#allocation5 + $0x1f0] sm:$0xff]  ;;  %v1771_v15 = vld [vmem:[#allocation5 + $0x220] sm:$0xff]  ;;  %v1778_v17 = vld [vmem:[#allocation5 + $0x208] sm:$0xff]  ;;  %v1723_v5 = vmov 0.0   ;;  %s1467_s1 = sshll.u32 %s1725_s0, 4  ;;  %s1469_s25 = sshll.u32 %s2656_s2, 4  ;;  %s1468_s1 = int_to_ptr.vmem [resolvable:$true] %s1467_s1  ;;  %s1470_s25 = int_to_ptr.hbm [resolvable:$true] %s1469_s25 }
  0x12   :  { %404 = vmatpush.msrb.mxu2 %v1751_v7  ;;  %1484 = vmatmul.msk.f32.vlgmr.msra.gmra.mxu1 %vm65_vm1, %v1748_v2  ;;  %v1776_v16 = vld [vmem:[#allocation5 + $0x1d0] sm:$0xff]  ;;  %v1781_v18 = vld [vmem:[#allocation5 + $0x1f8] sm:$0xff]  ;;  %v1784_v19 = vld [vmem:[#allocation5 + $0x200] sm:$0xff] }
  0x13   :  { %1487 = vmatmul.msk.f32.vlgmr.msra.gmra.mxu2 %vm65_vm1, %v1748_v2  ;;  %169 = vmatpush.msrb.mxu3 %v49_v9  ;;  %v1787_v20 = vld [vmem:[#allocation2 + $0x8] sm:$0xff]  ;;  %v1790_v21 = vld [vmem:[#allocation5 + $0x1b0] sm:$0xff]  ;;  %v1796_v23 = vld [vmem:[#allocation5 + $0x1e8] sm:$0xff] }
  0x14   :  { %405 = vmatpush.msrb.mxu2 %v1756_v10  ;;  %384 = vmatpush.msrb.mxu1 %v1764_v13  ;;  %v1793_v22 = vld [vmem:[#allocation5 + $0x1d8] sm:$0xff]  ;;  %v1800_v24 = vld [vmem:[#allocation5 + $0x190] sm:$0xff]  ;;  %v1802_v25 = vld [vmem:[#allocation5 + $0x1e0] sm:$0xff] }
  0x15   :  { %424 = vmatpush.msra.mxu3 %v1760_v11  ;;  %364 = vmatpush.msra.mxu0 %v1771_v15  ;;  %v1807_v26 = vld [vmem:[#allocation5 + $0x1b8] sm:$0xff]  ;;  %v1811_v27 = vld [vmem:[#allocation5 + $0x1c8] sm:$0xff]  ;;  %v1813_v28 = vld [vmem:[#allocation5 + $0x170] sm:$0xff] }
  0x16   :  { %406 = vmatpush.msrb.mxu2 %v1762_v12  ;;  %385 = vmatpush.msrb.mxu1 %v1778_v17  ;;  %v1816_v29 = vld [vmem:[#allocation5 + $0x198] sm:$0xff]  ;;  %v1819_v30 = vld [vmem:[#allocation5 + $0x1c0] sm:$0xff]  ;;  %v1824_v31 = vld [vmem:[#allocation5 + $0x1a8] sm:$0xff] }
  0x17   :  { %425 = vmatpush.msra.mxu3 %v1769_v14  ;;  %365 = vmatpush.msra.mxu0 %v1784_v19  ;;  %v1826_v32 = vld [vmem:[#allocation5 + $0x150] sm:$0xff]  ;;  %v1830_v33 = vld [vmem:[#allocation5 + $0x178] sm:$0xff]  ;;  %v1832_v34 = vld [vmem:[#allocation5 + $0x1a0] sm:$0xff] }
  0x18   :  { %407 = vmatpush.msrb.mxu2 %v1776_v16  ;;  %1482 = vmatmul.msk.f32.gmra.mxu3 %vm65_vm1, %v1787_v20  ;;  %v1836_v35 = vld [vmem:[#allocation5 + $0x188] sm:$0xff]  ;;  %v1840_v36 = vld [vmem:[#allocation5 + $0x158] sm:$0xff]  ;;  %v1842_v37 = vld [vmem:[#allocation5 + $0x130] sm:$0xff] }
  0x19   :  { %426 = vmatpush.msra.mxu3 %v1781_v18  ;;  %386 = vmatpush.msrb.mxu1 %v1796_v23  ;;  %2760 = vst [vmem:[#allocation11_spill] sm:$0xff] %v1842_v37  ;;  %v1846_v38 = vld [vmem:[#allocation5 + $0x180] sm:$0xff]  ;;  %v1848_v39 = vld [vmem:[#allocation5 + $0x168] sm:$0xff]  ;;  %v1853_v40 = vld [vmem:[#allocation5 + $0x138] sm:$0xff] }
  0x1a   :  { %408 = vmatpush.msrb.mxu2 %v1790_v21  ;;  %366 = vmatpush.msra.mxu0 %v1802_v25  ;;  %2761 = vst [vmem:[#allocation12_spill] sm:$0xff] %v1853_v40  ;;  %v1855_v41 = vld [vmem:[#allocation5 + $0x110] sm:$0xff]  ;;  %v1859_v42 = vld [vmem:[#allocation5 + $0x160] sm:$0xff]  ;;  %v1861_v43 = vld [vmem:[#allocation5 + $0x148] sm:$0xff] }
  0x1b   :  { %427 = vmatpush.msra.mxu3 %v1793_v22  ;;  %1485 = vmatmul.msk.f32.gmra.mxu1 %vm65_vm1, %v1787_v20  ;;  %2762 = vst [vmem:[#allocation13_spill] sm:$0xff] %v1855_v41  ;;  %v1865_v44 = vld [vmem:[#allocation5 + $0x118] sm:$0xff]  ;;  %v1867_v45 = vld [vmem:[#allocation5 + $0xf0] sm:$0xff]  ;;  %v1871_v46 = vld [vmem:[#allocation5 + $0x140] sm:$0xff] }
  0x1c   :  { %409 = vmatpush.msrb.mxu2 %v1800_v24  ;;  %387 = vmatpush.msrb.mxu1 %v1811_v27  ;;  %2763 = vst [vmem:[#allocation14_spill] sm:$0xff] %v1865_v44  ;;  %v1875_v47 = vld [vmem:[#allocation5 + $0xf8] sm:$0xff]  ;;  %v1877_v48 = vld [vmem:[#allocation5 + $0x128] sm:$0xff]  ;;  %v1881_v49 = vld [vmem:[#allocation5 + $0xd0] sm:$0xff] }
  0x1d   :  { %428 = vmatpush.msra.mxu3 %v1807_v26  ;;  %367 = vmatpush.msra.mxu0 %v1819_v30  ;;  %2764 = vst [vmem:[#allocation15_spill] sm:$0xff] %v1867_v45  ;;  %v1886_v50 = vld [vmem:[#allocation5 + $0xd8] sm:$0xff]  ;;  %v1888_v51 = vld [vmem:[#allocation5 + $0x120] sm:$0xff]  ;;  %v1892_v52 = vld [vmem:[#allocation5 + $0x108] sm:$0xff] }
  0x1e   :  { %410 = vmatpush.msrb.mxu2 %v1813_v28  ;;  %388 = vmatpush.msrb.mxu1 %v1824_v31  ;;  %2765 = vst [vmem:[#allocation16_spill] sm:$0xff] %v1875_v47  ;;  %v1894_v53 = vld [vmem:[#allocation5 + $0xb0] sm:$0xff]  ;;  %v1899_v54 = vld [vmem:[#allocation5 + $0xb8] sm:$0xff]  ;;  %v1901_v55 = vld [vmem:[#allocation5 + $0x100] sm:$0xff] }
  0x1f   :  { %429 = vmatpush.msra.mxu3 %v1816_v29  ;;  %368 = vmatpush.msra.mxu0 %v1832_v34  ;;  %2766 = vst [vmem:[#allocation17_spill] sm:$0xff] %v1877_v48  ;;  %v1905_v56 = vld [vmem:[#allocation5 + $0xe8] sm:$0xff]  ;;  %v1907_v57 = vld [vmem:[#allocation5 + $0x90] sm:$0xff]  ;;  %v1911_v58 = vld [vmem:[#allocation5 + $0x98] sm:$0xff] }
  0x20   :  { %411 = vmatpush.msrb.mxu2 %v1826_v32  ;;  %1490 = vmatmul.msk.f32.vlgmr.msrb.gmra.mxu3 %vm65_vm1, %v1748_v2  ;;  %2767 = vst [vmem:[#allocation18_spill] sm:$0xff] %v1881_v49  ;;  %v1913_v59 = vld [vmem:[#allocation5 + $0xe0] sm:$0xff]  ;;  %v1917_v60 = vld [vmem:[#allocation5 + $0xc8] sm:$0xff]  ;;  %v1919_v61 = vld [vmem:[#allocation5 + $0x70] sm:$0xff] }
  0x21   :  { %430 = vmatpush.msra.mxu3 %v1830_v33  ;;  %389 = vmatpush.msrb.mxu1 %v1836_v35  ;;  %2768 = vst [vmem:[#allocation19_spill] sm:$0xff] %v1886_v50  ;;  %v1923_v62 = vld [vmem:[#allocation5 + $0x78] sm:$0xff]  ;;  %v1925_v63 = vld [vmem:[#allocation5 + $0xc0] sm:$0xff]  ;;  %v1929_v0 = vld [vmem:[#allocation5 + $0xa8] sm:$0xff] }
  0x22   :  { %412 = vmatpush.msrb.mxu2 %v1842_v37  ;;  %369 = vmatpush.msra.mxu0 %v1846_v38  ;;  %2769 = vst [vmem:[#allocation20_spill] sm:$0xff] %v1892_v52  ;;  %v1931_v1 = vld [vmem:[#allocation5 + $0x50] sm:$0xff]  ;;  %v1935_v2 = vld [vmem:[#allocation5 + $0x58] sm:$0xff]  ;;  %v1939_v3 = vld [vmem:[#allocation5 + $0xa0] sm:$0xff] }
  0x23   :  { %431 = vmatpush.msra.mxu3 %v1840_v36  ;;  %390 = vmatpush.msrb.mxu1 %v1848_v39  ;;  %2770 = vst [vmem:[#allocation21_spill] sm:$0xff] %v1894_v53  ;;  %v1943_v4 = vld [vmem:[#allocation5 + $0x88] sm:$0xff]  ;;  %v1946_v6 = vld [vmem:[#allocation5 + $0x80] sm:$0xff] }
  0x24   :  { %413 = vmatpush.msrb.mxu2 %v1855_v41  ;;  %370 = vmatpush.msra.mxu0 %v1859_v42  ;;  %2771 = vst [vmem:[#allocation22_spill] sm:$0xff] %v1899_v54  ;;  %v1949_v8 = vld [vmem:[#allocation5 + $0x68] sm:$0xff]  ;;  %v1952_v9 = vld [vmem:[#allocation5 + $0x60] sm:$0xff] }
  0x25   :  { %432 = vmatpush.msra.mxu3 %v1853_v40  ;;  %391 = vmatpush.msrb.mxu1 %v1861_v43  ;;  %2772 = vst [vmem:[#allocation23_spill] sm:$0xff] %v1901_v55 }
  0x26   :  { %414 = vmatpush.msrb.mxu2 %v1867_v45  ;;  %371 = vmatpush.msra.mxu0 %v1871_v46  ;;  %2773 = vst [vmem:[#allocation24_spill] sm:$0xff] %v1905_v56 }
  0x27   :  { %433 = vmatpush.msra.mxu3 %v1865_v44  ;;  %1488 = vmatmul.msk.f32.gmra.mxu2 %vm65_vm1, %v1787_v20  ;;  %2774 = vst [vmem:[#allocation25_spill] sm:$0xff] %v1907_v57 }
  0x28   :  { %392 = vmatpush.msrb.mxu1 %v1877_v48  ;;  %1491 = vmatmul.msk.f32.gmra.mxu3 %vm65_vm1, %v1787_v20  ;;  %2775 = vst [vmem:[#allocation26_spill] sm:$0xff] %v1911_v58  ;;  %v1956_v20 = vld [vmem:[#allocation5 + $0x48] sm:$0xff] }
  0x29   :  { %434 = vmatpush.msra.mxu3 %v1875_v47  ;;  %415 = vmatpush.msrb.mxu2 %v1881_v49  ;;  %2776 = vst [vmem:[#allocation27_spill] sm:$0xff] %v1913_v59 }
  0x2a   :  { %372 = vmatpush.msra.mxu0 %v1888_v51  ;;  %393 = vmatpush.msrb.mxu1 %v1892_v52  ;;  %2777 = vst [vmem:[#allocation28_spill] sm:$0xff] %v1917_v60 }
  0x2b   :  { %435 = vmatpush.msra.mxu3 %v1886_v50  ;;  %416 = vmatpush.msrb.mxu2 %v1894_v53  ;;  %2778 = vst [vmem:[#allocation29_spill] sm:$0xff] %v1919_v61 }
  0x2c   :  { %373 = vmatpush.msra.mxu0 %v1901_v55  ;;  %394 = vmatpush.msrb.mxu1 %v1905_v56  ;;  %2779 = vst [vmem:[#allocation30_spill] sm:$0xff] %v1923_v62 }
  0x2d   :  { %436 = vmatpush.msra.mxu3 %v1899_v54  ;;  %417 = vmatpush.msrb.mxu2 %v1907_v57  ;;  %2780 = vst [vmem:[#allocation31_spill] sm:$0xff] %v1925_v63 }
  0x2e   :  { %374 = vmatpush.msra.mxu0 %v1913_v59  ;;  %2781 = vst [vmem:[#allocation32_spill] sm:$0xff] %v1929_v0  ;;  %395 = vmatpush.msrb.mxu1 %v1917_v60 }
  0x2f   :  { %437 = vmatpush.msra.mxu3 %v1911_v58  ;;  %2782 = vst [vmem:[#allocation33_spill] sm:$0xff] %v1931_v1  ;;  %418 = vmatpush.msrb.mxu2 %v1919_v61 }
  0x30   :  { %2783 = vst [vmem:[#allocation34_spill] sm:$0xff] %v1935_v2  ;;  %375 = vmatpush.msra.mxu0 %v1925_v63  ;;  %396 = vmatpush.msrb.mxu1 %v1929_v0 }
  0x31   :  { %438 = vmatpush.msra.mxu3 %v1923_v62  ;;  %2784 = vst [vmem:[#allocation35_spill] sm:$0xff] %v1939_v3  ;;  %419 = vmatpush.msrb.mxu2 %v1931_v1 }
  0x32   :  { %2785 = vst [vmem:[#allocation36_spill] sm:$0xff] %v1943_v4  ;;  %420 = vmatmul.f32.vlgmr.msrb.gmra.mxu2 %v1723_v5  ;;  %376 = vmatpush.msra.mxu0 %v1939_v3 }
  0x33   :  { %439 = vmatpush.msra.mxu3 %v1935_v2  ;;  %2786 = vst [vmem:[#allocation37_spill] sm:$0xff] %v1946_v6  ;;  %397 = vmatpush.msrb.mxu1 %v1943_v4  ;;  %v1960_v2 = vld [vmem:[#allocation5 + $0x40] sm:$0xff] }
  0x34   :  { %440 = vmatmul.f32.vlgmr.msra.gmra.mxu3 %v1723_v5  ;;  %2787 = vst [vmem:[#allocation38_spill] sm:$0xff] %v1949_v8  ;;  %529 = vmatpush.msra.mxu2 %v1751_v7 }
  0x35   :  { %2788 = vst [vmem:[#allocation39_spill] sm:$0xff] %v1952_v9  ;;  %377 = vmatpush.msra.mxu0 %v1946_v6  ;;  %549 = vmatpush.msrb.mxu3 %v1760_v11 }
  0x36   :  { %2789 = vst [vmem:[#allocation40_spill] sm:$0xff] %v1956_v20  ;;  %398 = vmatpush.msrb.mxu1 %v1949_v8  ;;  %530 = vmatpush.msra.mxu2 %v1756_v10 }
  0x37   :  { %2790 = vst [vmem:[#allocation41_spill] sm:$0xff] %v1960_v2  ;;  %378 = vmatpush.msra.mxu0 %v1952_v9  ;;  %550 = vmatpush.msrb.mxu3 %v1769_v14 }
  0x38   :  { %399 = vmatpush.msrb.mxu1 %v1956_v20  ;;  %531 = vmatpush.msra.mxu2 %v1762_v12 }
  0x39   :  { %400 = vmatmul.f32.vlgmr.msrb.gmra.mxu1 %v1723_v5  ;;  %379 = vmatpush.msra.mxu0 %v1960_v2 }
  0x3a   :  { %380 = vmatmul.f32.vlgmr.msra.gmra.mxu0 %v1723_v5  ;;  %509 = vmatpush.msra.mxu1 %v1764_v13  ;;  %v2791_v5 = vld [vmem:[#allocation34_spill] sm:$0xff] }
  0x3b   :  { %489 = vmatpush.msrb.mxu0 %v1771_v15  ;;  %551 = vmatpush.msrb.mxu3 %v1781_v18 }
  0x3c   :  { %510 = vmatpush.msra.mxu1 %v1778_v17  ;;  %532 = vmatpush.msra.mxu2 %v1776_v16 }
  0x3d   :  { %490 = vmatpush.msrb.mxu0 %v1784_v19  ;;  %552 = vmatpush.msrb.mxu3 %v1793_v22 }
  0x3e   :  { %511 = vmatpush.msra.mxu1 %v1796_v23  ;;  %533 = vmatpush.msra.mxu2 %v1790_v21 }
  0x3f   :  { %491 = vmatpush.msrb.mxu0 %v1802_v25  ;;  %553 = vmatpush.msrb.mxu3 %v1807_v26 }
  0x40   :  { %512 = vmatpush.msra.mxu1 %v1811_v27  ;;  %534 = vmatpush.msra.mxu2 %v1800_v24 }
  0x41   :  { %492 = vmatpush.msrb.mxu0 %v1819_v30  ;;  %554 = vmatpush.msrb.mxu3 %v1816_v29 }
  0x42   :  { %513 = vmatpush.msra.mxu1 %v1824_v31  ;;  %535 = vmatpush.msra.mxu2 %v1813_v28 }
  0x43   :  { %493 = vmatpush.msrb.mxu0 %v1832_v34  ;;  %555 = vmatpush.msrb.mxu3 %v1830_v33 }
  0x44   :  { %514 = vmatpush.msra.mxu1 %v1836_v35  ;;  %536 = vmatpush.msra.mxu2 %v1826_v32 }
  0x45   :  { %494 = vmatpush.msrb.mxu0 %v1846_v38  ;;  %556 = vmatpush.msrb.mxu3 %v1840_v36 }
  0x46   :  { %515 = vmatpush.msra.mxu1 %v1848_v39  ;;  %537 = vmatpush.msra.mxu2 %v1842_v37 }
  0x47   :  { %495 = vmatpush.msrb.mxu0 %v1859_v42  ;;  %557 = vmatpush.msrb.mxu3 %v1853_v40 }
  0x48   :  { %516 = vmatpush.msra.mxu1 %v1861_v43  ;;  %538 = vmatpush.msra.mxu2 %v1855_v41 }
  0x49   :  { %496 = vmatpush.msrb.mxu0 %v1871_v46  ;;  %558 = vmatpush.msrb.mxu3 %v1865_v44 }
  0x4a   :  { %517 = vmatpush.msra.mxu1 %v1877_v48  ;;  %539 = vmatpush.msra.mxu2 %v1867_v45 }
  0x4b   :  { %497 = vmatpush.msrb.mxu0 %v1888_v51  ;;  %559 = vmatpush.msrb.mxu3 %v1875_v47 }
  0x4c   :  { %518 = vmatpush.msra.mxu1 %v1892_v52  ;;  %540 = vmatpush.msra.mxu2 %v1881_v49 }
  0x4d   :  { %498 = vmatpush.msrb.mxu0 %v1901_v55  ;;  %560 = vmatpush.msrb.mxu3 %v1886_v50 }
  0x4e   :  { %519 = vmatpush.msra.mxu1 %v1905_v56  ;;  %541 = vmatpush.msra.mxu2 %v1894_v53 }
  0x4f   :  { %499 = vmatpush.msrb.mxu0 %v1913_v59  ;;  %561 = vmatpush.msrb.mxu3 %v1899_v54 }
  0x50   :  { %520 = vmatpush.msra.mxu1 %v1917_v60  ;;  %542 = vmatpush.msra.mxu2 %v1907_v57 }
  0x51   :  { %500 = vmatpush.msrb.mxu0 %v1925_v63  ;;  %562 = vmatpush.msrb.mxu3 %v1911_v58 }
  0x52   :  { %521 = vmatpush.msra.mxu1 %v1929_v0  ;;  %543 = vmatpush.msra.mxu2 %v1919_v61 }
  0x53   :  { %501 = vmatpush.msrb.mxu0 %v1939_v3  ;;  %563 = vmatpush.msrb.mxu3 %v1923_v62 }
  0x54   :  { %522 = vmatpush.msra.mxu1 %v1943_v4  ;;  %544 = vmatpush.msra.mxu2 %v1931_v1 }
  0x55   :  { %502 = vmatpush.msrb.mxu0 %v1946_v6  ;;  %564 = vmatpush.msrb.mxu3 %v2791_v5 }
  0x56   :  { %523 = vmatpush.msra.mxu1 %v1949_v8  ;;  %654 = vmatpush.msrb.mxu2 %v1751_v7 }
  0x57   :  { %503 = vmatpush.msrb.mxu0 %v1952_v9  ;;  %674 = vmatpush.msra.mxu3 %v1760_v11 }
  0x58   :  { %524 = vmatpush.msra.mxu1 %v1956_v20  ;;  %655 = vmatpush.msrb.mxu2 %v1756_v10 }
  0x59   :  { %504 = vmatpush.msrb.mxu0 %v1960_v2  ;;  %675 = vmatpush.msra.mxu3 %v1769_v14 }
  0x5a   :  { %634 = vmatpush.msrb.mxu1 %v1764_v13  ;;  %656 = vmatpush.msrb.mxu2 %v1762_v12 }
  0x5b   :  { %614 = vmatpush.msra.mxu0 %v1771_v15  ;;  %676 = vmatpush.msra.mxu3 %v1781_v18 }
  0x5c   :  { %635 = vmatpush.msrb.mxu1 %v1778_v17  ;;  %657 = vmatpush.msrb.mxu2 %v1776_v16 }
  0x5d   :  { %615 = vmatpush.msra.mxu0 %v1784_v19  ;;  %677 = vmatpush.msra.mxu3 %v1793_v22 }
  0x5e   :  { %636 = vmatpush.msrb.mxu1 %v1796_v23  ;;  %658 = vmatpush.msrb.mxu2 %v1790_v21 }
  0x5f   :  { %616 = vmatpush.msra.mxu0 %v1802_v25  ;;  %678 = vmatpush.msra.mxu3 %v1807_v26 }
  0x60   :  { %637 = vmatpush.msrb.mxu1 %v1811_v27  ;;  %659 = vmatpush.msrb.mxu2 %v1800_v24 }
  0x61   :  { %617 = vmatpush.msra.mxu0 %v1819_v30  ;;  %679 = vmatpush.msra.mxu3 %v1816_v29 }
  0x62   :  { %638 = vmatpush.msrb.mxu1 %v1824_v31  ;;  %660 = vmatpush.msrb.mxu2 %v1813_v28 }
  0x63   :  { %618 = vmatpush.msra.mxu0 %v1832_v34  ;;  %680 = vmatpush.msra.mxu3 %v1830_v33 }
  0x64   :  { %639 = vmatpush.msrb.mxu1 %v1836_v35  ;;  %661 = vmatpush.msrb.mxu2 %v1826_v32 }
  0x65   :  { %619 = vmatpush.msra.mxu0 %v1846_v38  ;;  %681 = vmatpush.msra.mxu3 %v1840_v36 }
  0x66   :  { %640 = vmatpush.msrb.mxu1 %v1848_v39  ;;  %662 = vmatpush.msrb.mxu2 %v1842_v37 }
  0x67   :  { %620 = vmatpush.msra.mxu0 %v1859_v42  ;;  %682 = vmatpush.msra.mxu3 %v1853_v40 }
  0x68   :  { %641 = vmatpush.msrb.mxu1 %v1861_v43  ;;  %663 = vmatpush.msrb.mxu2 %v1855_v41 }
  0x69   :  { %621 = vmatpush.msra.mxu0 %v1871_v46  ;;  %683 = vmatpush.msra.mxu3 %v1865_v44 }
  0x6a   :  { %642 = vmatpush.msrb.mxu1 %v1877_v48  ;;  %664 = vmatpush.msrb.mxu2 %v1867_v45 }
  0x6b   :  { %622 = vmatpush.msra.mxu0 %v1888_v51  ;;  %684 = vmatpush.msra.mxu3 %v1875_v47 }
  0x6c   :  { %643 = vmatpush.msrb.mxu1 %v1892_v52  ;;  %665 = vmatpush.msrb.mxu2 %v1881_v49 }
  0x6d   :  { %623 = vmatpush.msra.mxu0 %v1901_v55  ;;  %685 = vmatpush.msra.mxu3 %v1886_v50 }
  0x6e   :  { %644 = vmatpush.msrb.mxu1 %v1905_v56  ;;  %666 = vmatpush.msrb.mxu2 %v1894_v53 }
  0x6f   :  { %624 = vmatpush.msra.mxu0 %v1913_v59  ;;  %686 = vmatpush.msra.mxu3 %v1899_v54 }
  0x70   :  { %645 = vmatpush.msrb.mxu1 %v1917_v60  ;;  %667 = vmatpush.msrb.mxu2 %v1907_v57 }
  0x71   :  { %625 = vmatpush.msra.mxu0 %v1925_v63  ;;  %687 = vmatpush.msra.mxu3 %v1911_v58  ;;  %v55_v58 = vld [vmem:[#allocation5 + $0x240] ss:$8 sm:$0xf] }
  0x72   :  { %646 = vmatpush.msrb.mxu1 %v1929_v0  ;;  %668 = vmatpush.msrb.mxu2 %v1919_v61  ;;  %v58_v57 = vperm.slane %v55_v58, 1  ;;  %v59_v50 = vperm.slane %v55_v58, 2  ;;  %v60_v63 = vperm.slane %v55_v58, 3 }
  0x73   :  { %626 = vmatpush.msra.mxu0 %v1939_v3  ;;  %688 = vmatpush.msra.mxu3 %v1923_v62 }
  0x74   :  { %647 = vmatpush.msrb.mxu1 %v1943_v4  ;;  %669 = vmatpush.msrb.mxu2 %v1931_v1  ;;  %v57_v4 = vperm.slane %v55_v58, 0 }
  0x75   :  { %627 = vmatpush.msra.mxu0 %v1946_v6  ;;  %689 = vmatpush.msra.mxu3 %v2791_v5 }
  0x76   :  { %648 = vmatpush.msrb.mxu1 %v1949_v8 }
  0x77   :  { %628 = vmatpush.msra.mxu0 %v1952_v9 }
  0x78   :  { %649 = vmatpush.msrb.mxu1 %v1956_v20 }
  0x79   :  { %629 = vmatpush.msra.mxu0 %v1960_v2 }
  0x8f   :  { %v125_v61 = vpop.f32.mrf.mxu1 }
  0x90   :  { %v126_v54 = vadd.f32 %v125_v61, %v58_v57 }
  0x92   :  { %v185_v8 = vrot.slane %v126_v54, 6 }
  0x93   :  { %v102_v6 = vpop.f32.mrf.mxu3 }
  0x94   :  { %v103_v62 = vadd.f32 %v102_v6, %v57_v4 }
  0x96   :  { %v198_v1 = vsel %vm197_vm3, %v103_v62, %v185_v8  ;;  %v204_v9 = vsel %vm193_vm2, %v103_v62, %v185_v8  ;;  %v208_v5 = vsel %vm199_vm4, %v185_v8, %v103_v62  ;;  %v148_v49 = vpop.f32.mrf.mxu2  ;;  %v192_v44 = vsel %vm191_vm7, %v103_v62, %v185_v8 }
  0x97   :  { %v149_v54 = vadd.f32 %v148_v49, %v59_v50 }
  0x98   :  { %v128_v20 = vpop.f32.mrf.mxu1 }
  0x99   :  { %v129_v53 = vadd.f32 %v128_v20, %v58_v57  ;;  %v186_v45 = vrot.slane %v149_v54, 4 }
  0x9b   :  { %v105_v2 = vpop.f32.mrf.mxu3  ;;  %v188_v0 = vrot.slane %v129_v53, 6 }
  0x9c   :  { %v106_v3 = vadd.f32 %v105_v2, %v57_v4 }
  0x9e   :  { %v215_v61 = vsel %vm197_vm3, %v106_v3, %v188_v0  ;;  %v219_v60 = vsel %vm193_vm2, %v106_v3, %v188_v0  ;;  %v223_v6 = vsel %vm199_vm4, %v188_v0, %v106_v3 }
  0xa3   :  { %v171_v47 = vpop.f32.mrf.mxu3 }
  0xa4   :  { %v172_v56 = vadd.f32 %v171_v47, %v60_v63 }
  0xa6   :  { %v187_v59 = vrot.slane %v172_v56, 2  ;;  %v1724_v56 = vmov 1934713408  }
  0xa7   :  { %v241_v54 = vunpack.c.l.s4 %v1724_v56 }
  0xa8   :  { %v200_v53 = vsel %vm199_vm4, %v187_v59, %v186_v45  ;;  %v205_v57 = vsel %vm191_vm7, %v186_v45, %v187_v59  ;;  %v209_v2 = vsel %vm197_vm3, %v186_v45, %v187_v59  ;;  %v194_v4 = vsel %vm193_vm2, %v186_v45, %v187_v59 }
  0xa9   :  { %v202_v20 = vsel %vm201_vm6, %v198_v1, %v200_v53  ;;  %v206_v49 = vsel %vm195_vm5, %v205_v57, %v204_v9  ;;  %v2104_v58 = vsel %vm201_vm6, %v209_v2, %v208_v5  ;;  %v196_v37 = vsel %vm195_vm5, %v192_v44, %v194_v4 }
  0xaa   :  { %v151_v47 = vpop.f32.mrf.mxu2  ;;  %v203_v41 = vrot.slane %v202_v20, 2  ;;  %v207_v52 = vrot.slane %v206_v49, 4  ;;  %v212_v59 = vsel %vm191_vm7, %v106_v3, %v188_v0  ;;  %v242_v9 = vunpack.c.0.s8 %v241_v54 }
  0xab   :  { %v152_v55 = vadd.f32 %v151_v47, %v59_v50  ;;  %v174_v40 = vpop.f32.mrf.mxu3  ;;  %v211_v5 = vrot.slane %v2104_v58, 6  ;;  %v238_v53 = vrot.slane %v196_v37, 4 }
  0xac   :  { %v175_v48 = vadd.f32 %v174_v40, %v60_v63  ;;  %v254_v57 = vrot.slane %v203_v41, 4  ;;  %v270_v2 = vrot.slane %v207_v52, 4 }
  0xad   :  { %v189_v45 = vrot.slane %v152_v55, 4  ;;  %v286_v49 = vrot.slane %v211_v5, 4 }
  0xae   :  { %v190_v1 = vrot.slane %v175_v48, 2 }
  0xb0   :  { %v213_v62 = vsel %vm193_vm2, %v189_v45, %v190_v1  ;;  %v216_v8 = vsel %vm199_vm4, %v190_v1, %v189_v45  ;;  %v220_v50 = vsel %vm191_vm7, %v189_v45, %v190_v1  ;;  %v224_v44 = vsel %vm197_vm3, %v189_v45, %v190_v1 }
  0xb1   :  { %v214_v40 = vsel %vm195_vm5, %v212_v59, %v213_v62  ;;  %v217_v55 = vsel %vm201_vm6, %v215_v61, %v216_v8  ;;  %v221_v48 = vsel %vm195_vm5, %v220_v50, %v219_v60  ;;  %v225_v63 = vsel %vm201_vm6, %v224_v44, %v223_v6 }
  0xb2   :  { %v218_v0 = vrot.slane %v217_v55, 2  ;;  %v222_v3 = vrot.slane %v221_v48, 4  ;;  %v226_v4 = vrot.slane %v225_v63, 6  ;;  %v235_v20 = vrot.slane %v214_v40, 4 }
  0xb3   :  { %v239_v58 = vsel %vm236_vm8, %v214_v40, %v238_v53 }
  0xb4   :  { %v252_v47 = vrot.slane %v218_v0, 4  ;;  %v255_v56 = vsel %vm236_vm8, %v218_v0, %v254_v57  ;;  %v268_v54 = vrot.slane %v222_v3, 4  ;;  %v271_v45 = vsel %vm236_vm8, %v222_v3, %v270_v2 }
  0xb5   :  { %v421_v59 = vpop.f32.mrf.mxu2  ;;  %v284_v1 = vrot.slane %v226_v4, 4  ;;  %v287_v61 = vsel %vm236_vm8, %v226_v4, %v286_v49  ;;  %v237_v8 = vsel %vm236_vm8, %v235_v20, %v196_v37  ;;  %v247_v48 = vperm.slane %v239_v58, %v242_v9 }
  0xb6   :  { %v401_v60 = vpop.f32.mrf.mxu1  ;;  %v449_v62 = vrot.slane %v421_v59, 4  ;;  %v243_v55 = vperm.slane %v237_v8, %v242_v9  ;;  %v253_v40 = vsel %vm236_vm8, %v252_v47, %v203_v41  ;;  %v263_v57 = vperm.slane %v255_v56, %v242_v9 }
  0xb7   :  { %v441_v6 = vpop.f32.mrf.mxu3  ;;  %v448_v50 = vrot.slane %v401_v60, 6  ;;  %v381_v53 = vpop.f32.mrf.mxu0  ;;  %v269_v63 = vsel %vm236_vm8, %v268_v54, %v207_v52  ;;  %v279_v2 = vperm.slane %v271_v45, %v242_v9  ;;  %v248_v3 = vrot.slane %v247_v48, 4 }
  0xb8   :  { %v450_v44 = vrot.slane %v441_v6, 2  ;;  %v250_v4 = vrot.slane %v243_v55, 4  ;;  %v259_v37 = vperm.slane %v253_v40, %v242_v9  ;;  %v264_v20 = vrot.slane %v263_v57, 4 }
  0xb9   :  { %v451_v49 = vsel %vm191_vm7, %v381_v53, %v448_v50  ;;  %v275_v60 = vperm.slane %v269_v63, %v242_v9  ;;  %v249_v58 = vsel %vm236_vm8, %v248_v3, %v243_v55  ;;  %v280_v41 = vrot.slane %v279_v2, 4 }
  0xba   :  { %v452_v0 = vsel %vm193_vm2, %v449_v62, %v450_v44  ;;  %v2130_v6 = vsel %vm236_vm8, %v247_v48, %v250_v4  ;;  %v285_v52 = vsel %vm236_vm8, %v284_v1, %v211_v5  ;;  %v2134_v56 = vsel %vm236_vm8, %v264_v20, %v259_v37 }
  0xbb   :  { %v453_v59 = vsel %vm195_vm5, %v451_v49, %v452_v0  ;;  %2792 = vst [vmem:[#allocation42_spill] sm:$0xff] %v2134_v56  ;;  %v266_v54 = vrot.slane %v259_v37, 4  ;;  %v282_v45 = vrot.slane %v275_v60, 4  ;;  %v2137_v62 = vsel %vm236_vm8, %v280_v41, %v275_v60 }
  0xbc   :  { %v455_v47 = vadd.f32 %v453_v59, %v249_v58  ;;  %2793 = vst [vmem:[#allocation43_spill] sm:$0xff] %v2137_v62  ;;  %v291_v8 = vperm.slane %v285_v52, %v242_v9  ;;  %v295_v50 = vperm.slane %v287_v61, %v242_v9 }
  0xbd   :  { %v2140_v55 = vsel %vm236_vm8, %v263_v57, %v266_v54  ;;  %v2143_v48 = vsel %vm236_vm8, %v279_v2, %v282_v45 }
  0xbe   :  { %v1492_v44 = vmul.f32 -1.442695, %v455_v47  ;;  %2794 = vst [vmem:[#allocation44_spill] sm:$0xff] %v2140_v55  ;;  %v296_v53 = vrot.slane %v295_v50, 4  ;;  %v298_v5 = vrot.slane %v291_v8, 4  ;;  %v476_v3 = vrot.slane %v455_v47, 6 }
  0xbf   :  { %2795 = vst [vmem:[#allocation45_spill] sm:$0xff] %v2143_v48 }
  0xc0   :  { %1511 = vpow2.f32 %v1492_v44  ;;  %v2146_v1 = vsel %vm236_vm8, %v296_v53, %v291_v8  ;;  %v2149_v40 = vsel %vm236_vm8, %v295_v50, %v298_v5  ;;  %v2817_v44 = vld [vmem:[#allocation37_spill] sm:$0xff]  ;;  %v2818_v53 = vld [vmem:[#allocation36_spill] sm:$0xff] }
  0xc1   :  { %2796 = vst [vmem:[#allocation46_spill] sm:$0xff] %v2146_v1  ;;  %v2819_v5 = vld [vmem:[#allocation25_spill] sm:$0xff] }
  0xc2   :  { %2797 = vst [vmem:[#allocation47_spill] sm:$0xff] %v2149_v40 }
  0xc6   :  { %v1512_v63 = vpop.eup %1511 }
  0xc7   :  { %v459_v0 = vadd.f32 1.0, %v1512_v63  ;;  %v2820_v63 = vld [vmem:[#allocation26_spill] sm:$0xff] }
  0xc9   :  { %1513 = vrcp.f32 %v459_v0  ;;  %v471_v4 = vand.u32 2147483648, %v459_v0  ;;  %v469_v2 = vand.u32 2147483647, %v459_v0  ;;  %vm465_vm10 = vweird.f32 %v459_v0 }
  0xca   :  { %1515 = vtanh.f32 %v476_v3  ;;  %v2824_v3 = vld [vmem:[#allocation30_spill] sm:$0xff] }
  0xcb   :  { %v472_v37 = vor.u32 1.1754944e-38, %v471_v4  ;;  %vm470_vm12 = vcmp.eq.f32.partialorder %v469_v2, 8.507059e+37  ;;  %v2826_v4 = vld [vmem:[#allocation40_spill] sm:$0xff]  ;;  %v2828_v2 = vld [vmem:[#allocation34_spill] sm:$0xff] }
  0xcf   :  { %v1514_v9 = vpop.eup %1513 }
  0xd0   :  { %v461_v61 = vmul.f32 %v1514_v9, %v459_v0  ;;  %vm466_vm9 = vweird.f32 %v1514_v9  ;;  %v1516_v41 = vpop.eup %1515  ;;  %v2821_v0 = vld [vmem:[#allocation39_spill] sm:$0xff] }
  0xd1   :  { %vm467_vm11 = vmor %vm465_vm10, %vm466_vm9 }
  0xd2   :  { %v462_v57 = vsub.f32 1.0, %v461_v61  ;;  %v2823_v61 = vld [vmem:[#allocation29_spill] sm:$0xff] }
  0xd4   :  { %v463_v49 = vmul.f32 %v1514_v9, %v462_v57  ;;  %v2825_v57 = vld [vmem:[#allocation41_spill] sm:$0xff] }
  0xd6   :  { %v464_v59 = vadd.f32 %v1514_v9, %v463_v49  ;;  %v2827_v49 = vld [vmem:[#allocation33_spill] sm:$0xff] }
  0xd8   :  { %v468_v20 = vsel %vm467_vm11, %v1514_v9, %v464_v59  ;;  %v2822_v9 = vld [vmem:[#allocation38_spill] sm:$0xff] }
  0xd9   :  { %v473_v60 = vsel %vm470_vm12, %v472_v37, %v468_v20 }
  0xda   :  { %v480_v58 = vrot.slane %v473_v60, 2  ;;  %v483_v54 = vmul.f32 %v1516_v41, %v473_v60  ;;  %v486_v47 = vrot.slane %v473_v60, 4 }
  0xdc   :  { %v482_v52 = vmul.f32 0.0, %v480_v58 }
  0xde   :  { %v2151_v45 = vadd.f32 %v483_v54, %v482_v52 }
  0xe0   :  { %1517 = vtanh.f32 %v2151_v45 }
  0xe6   :  { %v1518_v8 = vpop.eup %1517 }
  0xe7   :  { %v488_v50 = vmul.f32 %v1518_v8, %v486_v47 }
  0xe9   :  { %505 = vmatmul.f32.vlgmr.msrb.gmra.mxu0 %v488_v50  ;;  %525 = vmatmul.f32.vlgmr.msra.gmra.mxu1 %v488_v50 }
  0xea   :  { %545 = vmatmul.f32.vlgmr.msra.gmra.mxu2 %v488_v50  ;;  %565 = vmatmul.f32.vlgmr.msrb.gmra.mxu3 %v488_v50 }
  0xeb   :  { %739 = vmatpush.msrb.mxu0 %v1771_v15  ;;  %759 = vmatpush.msra.mxu1 %v1764_v13  ;;  %v2802_v13 = vld [vmem:[#allocation20_spill] sm:$0xff]  ;;  %v2804_v15 = vld [vmem:[#allocation14_spill] sm:$0xff] }
  0xec   :  { %779 = vmatpush.msra.mxu2 %v1751_v7  ;;  %799 = vmatpush.msrb.mxu3 %v1760_v11  ;;  %v2798_v7 = vld [vmem:[#allocation17_spill] sm:$0xff]  ;;  %v2800_v11 = vld [vmem:[#allocation12_spill] sm:$0xff] }
  0xed   :  { %740 = vmatpush.msrb.mxu0 %v1784_v19  ;;  %760 = vmatpush.msra.mxu1 %v1778_v17  ;;  %v2806_v17 = vld [vmem:[#allocation24_spill] sm:$0xff] }
  0xee   :  { %780 = vmatpush.msra.mxu2 %v1756_v10  ;;  %800 = vmatpush.msrb.mxu3 %v1769_v14  ;;  %v2799_v10 = vld [vmem:[#allocation11_spill] sm:$0xff]  ;;  %v2803_v14 = vld [vmem:[#allocation13_spill] sm:$0xff]  ;;  %v2808_v19 = vld [vmem:[#allocation16_spill] sm:$0xff] }
  0xef   :  { %741 = vmatpush.msrb.mxu0 %v1802_v25  ;;  %761 = vmatpush.msra.mxu1 %v1796_v23  ;;  %v2811_v23 = vld [vmem:[#allocation18_spill] sm:$0xff] }
  0xf0   :  { %781 = vmatpush.msra.mxu2 %v1762_v12  ;;  %801 = vmatpush.msrb.mxu3 %v1781_v18  ;;  %v2801_v12 = vld [vmem:[#allocation23_spill] sm:$0xff] }
  0xf1   :  { %742 = vmatpush.msrb.mxu0 %v1819_v30  ;;  %762 = vmatpush.msra.mxu1 %v1811_v27  ;;  %v2807_v18 = vld [vmem:[#allocation15_spill] sm:$0xff] }
  0xf2   :  { %782 = vmatpush.msra.mxu2 %v1776_v16  ;;  %802 = vmatpush.msrb.mxu3 %v1793_v22  ;;  %v2805_v16 = vld [vmem:[#allocation27_spill] sm:$0xff]  ;;  %v2810_v22 = vld [vmem:[#allocation28_spill] sm:$0xff] }
  0xf3   :  { %743 = vmatpush.msrb.mxu0 %v1832_v34  ;;  %763 = vmatpush.msra.mxu1 %v1824_v31 }
  0xf4   :  { %783 = vmatpush.msra.mxu2 %v1790_v21  ;;  %803 = vmatpush.msrb.mxu3 %v1807_v26  ;;  %v2809_v21 = vld [vmem:[#allocation31_spill] sm:$0xff] }
  0xf5   :  { %744 = vmatpush.msrb.mxu0 %v1846_v38  ;;  %764 = vmatpush.msra.mxu1 %v1836_v35  ;;  %v2813_v26 = vld [vmem:[#allocation35_spill] sm:$0xff] }
  0xf6   :  { %784 = vmatpush.msra.mxu2 %v1800_v24  ;;  %804 = vmatpush.msrb.mxu3 %v1816_v29  ;;  %v2812_v24 = vld [vmem:[#allocation19_spill] sm:$0xff]  ;;  %v2815_v29 = vld [vmem:[#allocation21_spill] sm:$0xff] }
  0xf7   :  { %745 = vmatpush.msrb.mxu0 %v1859_v42  ;;  %765 = vmatpush.msra.mxu1 %v1848_v39 }
  0xf8   :  { %785 = vmatpush.msra.mxu2 %v1813_v28  ;;  %805 = vmatpush.msrb.mxu3 %v1830_v33  ;;  %v2814_v28 = vld [vmem:[#allocation32_spill] sm:$0xff] }
  0xf9   :  { %746 = vmatpush.msrb.mxu0 %v1871_v46  ;;  %766 = vmatpush.msra.mxu1 %v1861_v43 }
  0xfa   :  { %786 = vmatpush.msra.mxu2 %v1826_v32  ;;  %806 = vmatpush.msrb.mxu3 %v1840_v36  ;;  %v2816_v32 = vld [vmem:[#allocation22_spill] sm:$0xff] }
  0xfb   :  { %747 = vmatpush.msrb.mxu0 %v1888_v51  ;;  %767 = vmatpush.msra.mxu1 %v2798_v7 }
  0xfc   :  { %787 = vmatpush.msra.mxu2 %v2799_v10  ;;  %807 = vmatpush.msrb.mxu3 %v2800_v11 }
  0xfd   :  { %748 = vmatpush.msrb.mxu0 %v2801_v12  ;;  %768 = vmatpush.msra.mxu1 %v2802_v13 }
  0xfe   :  { %788 = vmatpush.msra.mxu2 %v2803_v14  ;;  %808 = vmatpush.msrb.mxu3 %v2804_v15 }
  0xff   :  { %749 = vmatpush.msrb.mxu0 %v2805_v16  ;;  %769 = vmatpush.msra.mxu1 %v2806_v17 }
 0x100   :  { %789 = vmatpush.msra.mxu2 %v2807_v18  ;;  %809 = vmatpush.msrb.mxu3 %v2808_v19 }
 0x101   :  { %750 = vmatpush.msrb.mxu0 %v2809_v21  ;;  %770 = vmatpush.msra.mxu1 %v2810_v22 }
 0x102   :  { %790 = vmatpush.msra.mxu2 %v2811_v23  ;;  %810 = vmatpush.msrb.mxu3 %v2812_v24 }
 0x103   :  { %751 = vmatpush.msrb.mxu0 %v2813_v26  ;;  %771 = vmatpush.msra.mxu1 %v2814_v28 }
 0x104   :  { %791 = vmatpush.msra.mxu2 %v2815_v29  ;;  %811 = vmatpush.msrb.mxu3 %v2816_v32 }
 0x105   :  { %752 = vmatpush.msrb.mxu0 %v2817_v44  ;;  %772 = vmatpush.msra.mxu1 %v2818_v53 }
 0x106   :  { %792 = vmatpush.msra.mxu2 %v2819_v5  ;;  %812 = vmatpush.msrb.mxu3 %v2820_v63 }
 0x107   :  { %753 = vmatpush.msrb.mxu0 %v2821_v0  ;;  %773 = vmatpush.msra.mxu1 %v2822_v9 }
 0x108   :  { %793 = vmatpush.msra.mxu2 %v2823_v61  ;;  %813 = vmatpush.msrb.mxu3 %v2824_v3 }
 0x109   :  { %754 = vmatpush.msrb.mxu0 %v2825_v57  ;;  %774 = vmatpush.msra.mxu1 %v2826_v4 }
 0x10a   :  { %794 = vmatpush.msra.mxu2 %v2827_v49  ;;  %814 = vmatpush.msrb.mxu3 %v2828_v2 }
 0x166   :  { %v526_v59 = vpop.f32.mrf.mxu1  ;;  %v506_v52 = vpop.f32.mrf.mxu0 }
 0x167   :  { %v573_v37 = vrot.slane %v526_v59, 6 }
 0x169   :  { %v576_v54 = vsel %vm191_vm7, %v506_v52, %v573_v37 }
 0x16d   :  { %v546_v20 = vpop.f32.mrf.mxu2  ;;  %v566_v60 = vpop.f32.mrf.mxu3 }
 0x16e   :  { %v574_v58 = vrot.slane %v546_v20, 4  ;;  %v575_v41 = vrot.slane %v566_v60, 2 }
 0x170   :  { %v577_v47 = vsel %vm193_vm2, %v574_v58, %v575_v41 }
 0x171   :  { %v578_v8 = vsel %vm195_vm5, %v576_v54, %v577_v47 }
 0x172   :  { %v580_v50 = vadd.f32 %v578_v8, %v2130_v6 }
 0x174   :  { %v1493_v40 = vmul.f32 -1.442695, %v580_v50  ;;  %v601_v55 = vrot.slane %v580_v50, 6 }
 0x176   :  { %1519 = vpow2.f32 %v1493_v40 }
 0x17c   :  { %v1520_v1 = vpop.eup %1519 }
 0x17d   :  { %v584_v48 = vadd.f32 1.0, %v1520_v1 }
 0x17f   :  { %1521 = vrcp.f32 %v584_v48  ;;  %v596_v20 = vand.u32 2147483648, %v584_v48  ;;  %v594_v2 = vand.u32 2147483647, %v584_v48  ;;  %vm590_vm14 = vweird.f32 %v584_v48 }
 0x180   :  { %1523 = vtanh.f32 %v601_v55  ;;  %v2226_v55 = vld [vmem:[#allocation5 + $0x220] sm:$0xff] }
 0x181   :  { %v597_v58 = vor.u32 1.1754944e-38, %v596_v20  ;;  %vm595_vm0 = vcmp.eq.f32.partialorder %v594_v2, 8.507059e+37  ;;  %v2238_v2 = vld [vmem:[#allocation5 + $0x200] sm:$0xff]  ;;  %v2244_v20 = vld [vmem:[#allocation5 + $0x210] sm:$0xff] }
 0x185   :  { %v1522_v62 = vpop.eup %1521 }
 0x186   :  { %v586_v59 = vmul.f32 %v1522_v62, %v584_v48  ;;  %vm591_vm13 = vweird.f32 %v1522_v62  ;;  %v1524_v52 = vpop.eup %1523  ;;  %v2232_v48 = vld [vmem:[#allocation5 + $0x230] sm:$0xff] }
 0x187   :  { %vm592_vm15 = vmor %vm590_vm14, %vm591_vm13 }
 0x188   :  { %v587_v56 = vsub.f32 1.0, %v586_v59  ;;  %v2241_v59 = vld [vmem:[#allocation5 + $0x208] sm:$0xff] }
 0x18a   :  { %v588_v60 = vmul.f32 %v1522_v62, %v587_v56 }
 0x18c   :  { %v589_v37 = vadd.f32 %v1522_v62, %v588_v60  ;;  %v2247_v60 = vld [vmem:[#allocation5 + $0x218] sm:$0xff] }
 0x18e   :  { %v593_v41 = vsel %vm592_vm15, %v1522_v62, %v589_v37  ;;  %v2229_v62 = vld [vmem:[#allocation5 + $0x228] sm:$0xff] }
 0x18f   :  { %v598_v6 = vsel %vm595_vm0, %v597_v58, %v593_v41  ;;  %v2251_v37 = vld [vmem:[#allocation5 + $0x1e8] sm:$0xff]  ;;  %v2254_v58 = vld [vmem:[#allocation5 + $0x1f0] sm:$0xff]  ;;  %v2257_v41 = vld [vmem:[#allocation5 + $0x1f8] sm:$0xff] }
 0x190   :  { %v605_v40 = vrot.slane %v598_v6, 2  ;;  %v608_v54 = vmul.f32 %v1524_v52, %v598_v6  ;;  %v611_v56 = vrot.slane %v598_v6, 4  ;;  %v2262_v6 = vld [vmem:[#allocation5 + $0x1d0] sm:$0xff]  ;;  %v2273_v52 = vld [vmem:[#allocation5 + $0x1b8] sm:$0xff] }
 0x192   :  { %v607_v1 = vmul.f32 %v605_v40, %v2151_v45  ;;  %v2235_v45 = vld [vmem:[#allocation5 + $0x238] sm:$0xff]  ;;  %v2270_v40 = vld [vmem:[#allocation5 + $0x1b0] sm:$0xff] }
 0x194   :  { %v2223_v47 = vadd.f32 %v608_v54, %v607_v1  ;;  %v2361_v1 = vld [vmem:[#allocation5 + $0x1a8] sm:$0xff]  ;;  %v2366_v54 = vld [vmem:[#allocation5 + $0x180] sm:$0xff] }
 0x196   :  { %1525 = vtanh.f32 %v2223_v47 }
 0x19c   :  { %v1526_v8 = vpop.eup %1525 }
 0x19d   :  { %v613_v50 = vmul.f32 %v1526_v8, %v611_v56  ;;  %v2374_v56 = vld [vmem:[#allocation5 + $0x160] sm:$0xff]  ;;  %v2377_v8 = vld [vmem:[#allocation5 + $0x168] sm:$0xff] }
 0x19f   :  { %630 = vmatmul.f32.vlgmr.msra.gmra.mxu0 %v613_v50  ;;  %650 = vmatmul.f32.vlgmr.msrb.gmra.mxu1 %v613_v50 }
 0x1a0   :  { %670 = vmatmul.f32.vlgmr.msrb.gmra.mxu2 %v613_v50  ;;  %690 = vmatmul.f32.vlgmr.msra.gmra.mxu3 %v613_v50  ;;  %v2381_v50 = vld [vmem:[#allocation5 + $0x178] sm:$0xff] }
 0x1a1   :  { %864 = vmatpush.msra.mxu0 %v2226_v55  ;;  %884 = vmatpush.msrb.mxu1 %v2229_v62 }
 0x1a2   :  { %904 = vmatpush.msrb.mxu2 %v2232_v48  ;;  %924 = vmatpush.msra.mxu3 %v2235_v45 }
 0x1a3   :  { %865 = vmatpush.msra.mxu0 %v2238_v2  ;;  %885 = vmatpush.msrb.mxu1 %v2241_v59 }
 0x1a4   :  { %905 = vmatpush.msrb.mxu2 %v2244_v20  ;;  %925 = vmatpush.msra.mxu3 %v2247_v60 }
 0x1a5   :  { %866 = vmatpush.msra.mxu0 %v1802_v25  ;;  %886 = vmatpush.msrb.mxu1 %v2251_v37  ;;  %v2265_v25 = vld [vmem:[#allocation5 + $0x1d8] sm:$0xff] }
 0x1a6   :  { %906 = vmatpush.msrb.mxu2 %v2254_v58  ;;  %926 = vmatpush.msra.mxu3 %v2257_v41 }
 0x1a7   :  { %867 = vmatpush.msra.mxu0 %v1819_v30  ;;  %887 = vmatpush.msrb.mxu1 %v1811_v27  ;;  %v2278_v27 = vld [vmem:[#allocation5 + $0x190] sm:$0xff]  ;;  %v2281_v30 = vld [vmem:[#allocation5 + $0x198] sm:$0xff] }
 0x1a8   :  { %907 = vmatpush.msrb.mxu2 %v2262_v6  ;;  %927 = vmatpush.msra.mxu3 %v2265_v25 }
 0x1a9   :  { %868 = vmatpush.msra.mxu0 %v1832_v34  ;;  %888 = vmatpush.msrb.mxu1 %v1824_v31  ;;  %v2286_v31 = vld [vmem:[#allocation5 + $0x170] sm:$0xff] }
 0x1aa   :  { %908 = vmatpush.msrb.mxu2 %v2270_v40  ;;  %928 = vmatpush.msra.mxu3 %v2273_v52  ;;  %v2292_v34 = vld [vmem:[#allocation5 + $0x150] sm:$0xff] }
 0x1ab   :  { %869 = vmatpush.msra.mxu0 %v1846_v38  ;;  %889 = vmatpush.msrb.mxu1 %v1836_v35 }
 0x1ac   :  { %909 = vmatpush.msrb.mxu2 %v2278_v27  ;;  %929 = vmatpush.msra.mxu3 %v2281_v30 }
 0x1ad   :  { %870 = vmatpush.msra.mxu0 %v1859_v42  ;;  %890 = vmatpush.msrb.mxu1 %v1848_v39 }
 0x1ae   :  { %910 = vmatpush.msrb.mxu2 %v2286_v31  ;;  %930 = vmatpush.msra.mxu3 %v1830_v33  ;;  %v2829_v33 = vld [vmem:[#allocation34_spill] sm:$0xff] }
 0x1af   :  { %871 = vmatpush.msra.mxu0 %v1871_v46  ;;  %891 = vmatpush.msrb.mxu1 %v1861_v43 }
 0x1b0   :  { %911 = vmatpush.msrb.mxu2 %v2292_v34  ;;  %931 = vmatpush.msra.mxu3 %v1840_v36 }
 0x1b1   :  { %872 = vmatpush.msra.mxu0 %v1888_v51  ;;  %892 = vmatpush.msrb.mxu1 %v2798_v7 }
 0x1b2   :  { %912 = vmatpush.msrb.mxu2 %v2799_v10  ;;  %932 = vmatpush.msra.mxu3 %v2800_v11  ;;  %v2830_v11 = vld [vmem:[#allocation42_spill] sm:$0xff] }
 0x1b3   :  { %873 = vmatpush.msra.mxu0 %v2801_v12  ;;  %893 = vmatpush.msrb.mxu1 %v2802_v13 }
 0x1b4   :  { %913 = vmatpush.msrb.mxu2 %v2803_v14  ;;  %933 = vmatpush.msra.mxu3 %v2804_v15 }
 0x1b5   :  { %874 = vmatpush.msra.mxu0 %v2805_v16  ;;  %894 = vmatpush.msrb.mxu1 %v2806_v17 }
 0x1b6   :  { %914 = vmatpush.msrb.mxu2 %v2807_v18  ;;  %934 = vmatpush.msra.mxu3 %v2808_v19 }
 0x1b7   :  { %875 = vmatpush.msra.mxu0 %v2809_v21  ;;  %895 = vmatpush.msrb.mxu1 %v2810_v22 }
 0x1b8   :  { %915 = vmatpush.msrb.mxu2 %v2811_v23  ;;  %935 = vmatpush.msra.mxu3 %v2812_v24 }
 0x1b9   :  { %876 = vmatpush.msra.mxu0 %v2813_v26  ;;  %896 = vmatpush.msrb.mxu1 %v2814_v28 }
 0x1ba   :  { %916 = vmatpush.msrb.mxu2 %v2815_v29  ;;  %936 = vmatpush.msra.mxu3 %v2816_v32 }
 0x1bb   :  { %877 = vmatpush.msra.mxu0 %v2817_v44  ;;  %897 = vmatpush.msrb.mxu1 %v2818_v53 }
 0x1bc   :  { %917 = vmatpush.msrb.mxu2 %v2819_v5  ;;  %937 = vmatpush.msra.mxu3 %v2820_v63 }
 0x1bd   :  { %878 = vmatpush.msra.mxu0 %v2821_v0  ;;  %898 = vmatpush.msrb.mxu1 %v2822_v9 }
 0x1be   :  { %918 = vmatpush.msrb.mxu2 %v2823_v61  ;;  %938 = vmatpush.msra.mxu3 %v2824_v3  ;;  %v2344_v3 = vld [vmem:[#allocation5 + $0x1e0] sm:$0xff] }
 0x1bf   :  { %879 = vmatpush.msra.mxu0 %v2825_v57  ;;  %899 = vmatpush.msrb.mxu1 %v2826_v4  ;;  %v2350_v57 = vld [vmem:[#allocation5 + $0x1c0] sm:$0xff]  ;;  %v2353_v4 = vld [vmem:[#allocation5 + $0x1c8] sm:$0xff] }
 0x1c0   :  { %919 = vmatpush.msrb.mxu2 %v2827_v49  ;;  %939 = vmatpush.msra.mxu3 %v2829_v33  ;;  %v2358_v49 = vld [vmem:[#allocation5 + $0x1a0] sm:$0xff] }
 0x1c1   :  { %v2384_v33 = vld [vmem:[#allocation5 + $0x140] sm:$0xff] }
 0x21c   :  { %v651_v35 = vpop.f32.mrf.mxu1  ;;  %v631_v46 = vpop.f32.mrf.mxu0 }
 0x21d   :  { %v698_v36 = vrot.slane %v651_v35, 6  ;;  %v2387_v35 = vld [vmem:[#allocation5 + $0x148] sm:$0xff] }
 0x21f   :  { %v701_v51 = vsel %vm191_vm7, %v631_v46, %v698_v36  ;;  %v2391_v36 = vld [vmem:[#allocation5 + $0x158] sm:$0xff]  ;;  %v2406_v46 = vld [vmem:[#allocation5 + $0x100] sm:$0xff] }
 0x223   :  { %v671_v38 = vpop.f32.mrf.mxu2  ;;  %v691_v39 = vpop.f32.mrf.mxu3 }
 0x224   :  { %v699_v42 = vrot.slane %v671_v38, 4  ;;  %v700_v43 = vrot.slane %v691_v39, 2  ;;  %v2394_v38 = vld [vmem:[#allocation5 + $0x120] sm:$0xff]  ;;  %v2397_v39 = vld [vmem:[#allocation5 + $0x128] sm:$0xff] }
 0x226   :  { %v702_v7 = vsel %vm193_vm2, %v699_v42, %v700_v43  ;;  %v2400_v42 = vld [vmem:[#allocation5 + $0x130] sm:$0xff]  ;;  %v2403_v43 = vld [vmem:[#allocation5 + $0x138] sm:$0xff] }
 0x227   :  { %v703_v10 = vsel %vm195_vm5, %v701_v51, %v702_v7  ;;  %v2409_v51 = vld [vmem:[#allocation5 + $0x108] sm:$0xff]  ;;  %v2412_v7 = vld [vmem:[#allocation5 + $0x110] sm:$0xff] }
 0x228   :  { %v705_v12 = vadd.f32 %v703_v10, %v2830_v11  ;;  %v2415_v10 = vld [vmem:[#allocation5 + $0x118] sm:$0xff]  ;;  %v2418_v11 = vld [vmem:[#allocation5 + $0xe0] sm:$0xff] }
 0x22a   :  { %v1494_v13 = vmul.f32 -1.442695, %v705_v12  ;;  %v726_v18 = vrot.slane %v705_v12, 6  ;;  %v2421_v12 = vld [vmem:[#allocation5 + $0xe8] sm:$0xff] }
 0x22c   :  { %1527 = vpow2.f32 %v1494_v13  ;;  %v2424_v13 = vld [vmem:[#allocation5 + $0xf0] sm:$0xff] }
 0x232   :  { %v1528_v14 = vpop.eup %1527 }
 0x233   :  { %v709_v15 = vadd.f32 1.0, %v1528_v14  ;;  %v2427_v14 = vld [vmem:[#allocation5 + $0xf8] sm:$0xff] }
 0x235   :  { %1529 = vrcp.f32 %v709_v15  ;;  %v721_v21 = vand.u32 2147483648, %v709_v15  ;;  %v719_v23 = vand.u32 2147483647, %v709_v15  ;;  %vm715_vm3 = vweird.f32 %v709_v15 }
 0x236   :  { %1531 = vtanh.f32 %v726_v18  ;;  %v2439_v18 = vld [vmem:[#allocation5 + $0xd8] sm:$0xff] }
 0x237   :  { %v722_v26 = vor.u32 1.1754944e-38, %v721_v21  ;;  %vm720_vm6 = vcmp.eq.f32.partialorder %v719_v23, 8.507059e+37  ;;  %2834 = vst [vmem:[#allocation23_spill] sm:$0xff] %v2439_v18  ;;  %v2445_v21 = vld [vmem:[#allocation5 + $0xa8] sm:$0xff]  ;;  %v2451_v23 = vld [vmem:[#allocation5 + $0xb8] sm:$0xff] }
 0x238   :  { %2836 = vst [vmem:[#allocation13_spill] sm:$0xff] %v2445_v21 }
 0x239   :  { %2838 = vst [vmem:[#allocation27_spill] sm:$0xff] %v2451_v23 }
 0x23b   :  { %v1530_v16 = vpop.eup %1529 }
 0x23c   :  { %v711_v17 = vmul.f32 %v1530_v16, %v709_v15  ;;  %vm716_vm1 = vweird.f32 %v1530_v16  ;;  %v1532_v44 = vpop.eup %1531  ;;  %v2430_v15 = vld [vmem:[#allocation5 + $0xc0] sm:$0xff] }
 0x23d   :  { %vm717_vm4 = vmor %vm715_vm3, %vm716_vm1  ;;  %2831 = vst [vmem:[#allocation17_spill] sm:$0xff] %v2430_v15 }
 0x23e   :  { %v712_v19 = vsub.f32 1.0, %v711_v17  ;;  %v2436_v17 = vld [vmem:[#allocation5 + $0xd0] sm:$0xff] }
 0x23f   :  { %2833 = vst [vmem:[#allocation12_spill] sm:$0xff] %v2436_v17 }
 0x240   :  { %v713_v22 = vmul.f32 %v1530_v16, %v712_v19  ;;  %v2442_v19 = vld [vmem:[#allocation5 + $0xa0] sm:$0xff] }
 0x241   :  { %2835 = vst [vmem:[#allocation20_spill] sm:$0xff] %v2442_v19 }
 0x242   :  { %v714_v24 = vadd.f32 %v1530_v16, %v713_v22  ;;  %v2448_v22 = vld [vmem:[#allocation5 + $0xb0] sm:$0xff] }
 0x243   :  { %2837 = vst [vmem:[#allocation14_spill] sm:$0xff] %v2448_v22 }
 0x244   :  { %v718_v28 = vsel %vm717_vm4, %v1530_v16, %v714_v24  ;;  %v2433_v16 = vld [vmem:[#allocation5 + $0xc8] sm:$0xff]  ;;  %v2454_v24 = vld [vmem:[#allocation5 + $0x80] sm:$0xff] }
 0x245   :  { %v723_v29 = vsel %vm720_vm6, %v722_v26, %v718_v28  ;;  %2832 = vst [vmem:[#allocation11_spill] sm:$0xff] %v2433_v16  ;;  %v2457_v26 = vld [vmem:[#allocation5 + $0x88] sm:$0xff]  ;;  %v2460_v28 = vld [vmem:[#allocation5 + $0x90] sm:$0xff] }
 0x246   :  { %v730_v32 = vrot.slane %v723_v29, 2  ;;  %v733_v5 = vmul.f32 %v1532_v44, %v723_v29  ;;  %v736_v0 = vrot.slane %v723_v29, 4  ;;  %2839 = vst [vmem:[#allocation24_spill] sm:$0xff] %v2454_v24  ;;  %v2463_v29 = vld [vmem:[#allocation5 + $0x98] sm:$0xff]  ;;  %v2469_v44 = vld [vmem:[#allocation5 + $0x68] sm:$0xff] }
 0x247   :  { %2840 = vst [vmem:[#allocation15_spill] sm:$0xff] %v2457_v26 }
 0x248   :  { %v732_v53 = vmul.f32 %v730_v32, %v2223_v47  ;;  %v2369_v47 = vld [vmem:[#allocation5 + $0x188] sm:$0xff]  ;;  %2841 = vst [vmem:[#allocation16_spill] sm:$0xff] %v2460_v28  ;;  %v2466_v32 = vld [vmem:[#allocation5 + $0x60] sm:$0xff] }
 0x249   :  { %2842 = vst [vmem:[#allocation31_spill] sm:$0xff] %v2463_v29 }
 0x24a   :  { %v2333_v63 = vadd.f32 %v733_v5, %v732_v53  ;;  %2843 = vst [vmem:[#allocation28_spill] sm:$0xff] %v2466_v32  ;;  %v2472_v53 = vld [vmem:[#allocation5 + $0x70] sm:$0xff]  ;;  %v2475_v5 = vld [vmem:[#allocation5 + $0x78] sm:$0xff] }
 0x24b   :  { %2844 = vst [vmem:[#allocation18_spill] sm:$0xff] %v2469_v44 }
 0x24c   :  { %1533 = vtanh.f32 %v2333_v63  ;;  %2845 = vst [vmem:[#allocation19_spill] sm:$0xff] %v2472_v53 }
 0x24d   :  { %2846 = vst [vmem:[#allocation35_spill] sm:$0xff] %v2475_v5 }
 0x252   :  { %v1534_v9 = vpop.eup %1533 }
 0x253   :  { %v738_v61 = vmul.f32 %v1534_v9, %v736_v0  ;;  %v2478_v0 = vld [vmem:[#allocation5 + $0x40] sm:$0xff]  ;;  %v2481_v9 = vld [vmem:[#allocation5 + $0x48] sm:$0xff] }
 0x254   :  { %2847 = vst [vmem:[#allocation32_spill] sm:$0xff] %v2478_v0 }
 0x255   :  { %755 = vmatmul.f32.vlgmr.msrb.gmra.mxu0 %v738_v61  ;;  %775 = vmatmul.f32.vlgmr.msra.gmra.mxu1 %v738_v61  ;;  %2848 = vst [vmem:[#allocation21_spill] sm:$0xff] %v2481_v9 }
 0x256   :  { %795 = vmatmul.f32.vlgmr.msra.gmra.mxu2 %v738_v61  ;;  %815 = vmatmul.f32.vlgmr.msrb.gmra.mxu3 %v738_v61  ;;  %v2484_v61 = vld [vmem:[#allocation5 + $0x50] sm:$0xff] }
 0x257   :  { %989 = vmatpush.msrb.mxu0 %v2226_v55  ;;  %1009 = vmatpush.msra.mxu1 %v2229_v62  ;;  %2849 = vst [vmem:[#allocation22_spill] sm:$0xff] %v2484_v61 }
 0x258   :  { %1029 = vmatpush.msra.mxu2 %v2232_v48  ;;  %1049 = vmatpush.msrb.mxu3 %v2235_v45 }
 0x259   :  { %990 = vmatpush.msrb.mxu0 %v2238_v2  ;;  %1010 = vmatpush.msra.mxu1 %v2241_v59 }
 0x25a   :  { %1030 = vmatpush.msra.mxu2 %v2244_v20  ;;  %1050 = vmatpush.msrb.mxu3 %v2247_v60 }
 0x25b   :  { %991 = vmatpush.msrb.mxu0 %v2344_v3  ;;  %1011 = vmatpush.msra.mxu1 %v2251_v37 }
 0x25c   :  { %1031 = vmatpush.msra.mxu2 %v2254_v58  ;;  %1051 = vmatpush.msrb.mxu3 %v2257_v41 }
 0x25d   :  { %992 = vmatpush.msrb.mxu0 %v2350_v57  ;;  %1012 = vmatpush.msra.mxu1 %v2353_v4 }
 0x25e   :  { %1032 = vmatpush.msra.mxu2 %v2262_v6  ;;  %1052 = vmatpush.msrb.mxu3 %v2265_v25 }
 0x25f   :  { %993 = vmatpush.msrb.mxu0 %v2358_v49  ;;  %1013 = vmatpush.msra.mxu1 %v2361_v1 }
 0x260   :  { %1033 = vmatpush.msra.mxu2 %v2270_v40  ;;  %1053 = vmatpush.msrb.mxu3 %v2273_v52 }
 0x261   :  { %994 = vmatpush.msrb.mxu0 %v2366_v54  ;;  %1014 = vmatpush.msra.mxu1 %v2369_v47 }
 0x262   :  { %1034 = vmatpush.msra.mxu2 %v2278_v27  ;;  %1054 = vmatpush.msrb.mxu3 %v2281_v30 }
 0x263   :  { %995 = vmatpush.msrb.mxu0 %v2374_v56  ;;  %1015 = vmatpush.msra.mxu1 %v2377_v8 }
 0x264   :  { %1035 = vmatpush.msra.mxu2 %v2286_v31  ;;  %1055 = vmatpush.msrb.mxu3 %v2381_v50 }
 0x265   :  { %996 = vmatpush.msrb.mxu0 %v2384_v33  ;;  %1016 = vmatpush.msra.mxu1 %v2387_v35 }
 0x266   :  { %1036 = vmatpush.msra.mxu2 %v2292_v34  ;;  %1056 = vmatpush.msrb.mxu3 %v2391_v36 }
 0x267   :  { %997 = vmatpush.msrb.mxu0 %v2394_v38  ;;  %1017 = vmatpush.msra.mxu1 %v2397_v39 }
 0x268   :  { %1037 = vmatpush.msra.mxu2 %v2400_v42  ;;  %1057 = vmatpush.msrb.mxu3 %v2403_v43 }
 0x269   :  { %998 = vmatpush.msrb.mxu0 %v2406_v46  ;;  %1018 = vmatpush.msra.mxu1 %v2409_v51 }
 0x26a   :  { %1038 = vmatpush.msra.mxu2 %v2412_v7  ;;  %1058 = vmatpush.msrb.mxu3 %v2415_v10 }
 0x26b   :  { %999 = vmatpush.msrb.mxu0 %v2418_v11  ;;  %1019 = vmatpush.msra.mxu1 %v2421_v12 }
 0x26c   :  { %1039 = vmatpush.msra.mxu2 %v2424_v13  ;;  %1059 = vmatpush.msrb.mxu3 %v2427_v14 }
 0x26d   :  { %1000 = vmatpush.msrb.mxu0 %v2430_v15  ;;  %1020 = vmatpush.msra.mxu1 %v2433_v16 }
 0x26e   :  { %1040 = vmatpush.msra.mxu2 %v2436_v17  ;;  %1060 = vmatpush.msrb.mxu3 %v2439_v18 }
 0x26f   :  { %1001 = vmatpush.msrb.mxu0 %v2442_v19  ;;  %1021 = vmatpush.msra.mxu1 %v2445_v21 }
 0x270   :  { %1041 = vmatpush.msra.mxu2 %v2448_v22  ;;  %1061 = vmatpush.msrb.mxu3 %v2451_v23  ;;  %v2851_v22 = vld [vmem:[#allocation44_spill] sm:$0xff] }
 0x271   :  { %1002 = vmatpush.msrb.mxu0 %v2454_v24  ;;  %1022 = vmatpush.msra.mxu1 %v2457_v26 }
 0x272   :  { %1042 = vmatpush.msra.mxu2 %v2460_v28  ;;  %1062 = vmatpush.msrb.mxu3 %v2463_v29 }
 0x273   :  { %1003 = vmatpush.msrb.mxu0 %v2466_v32  ;;  %1023 = vmatpush.msra.mxu1 %v2469_v44  ;;  %v2487_v44 = vld [vmem:[#allocation5 + $0x58] sm:$0xff] }
 0x274   :  { %1043 = vmatpush.msra.mxu2 %v2472_v53  ;;  %1063 = vmatpush.msrb.mxu3 %v2475_v5  ;;  %2850 = vst [vmem:[#allocation37_spill] sm:$0xff] %v2487_v44 }
 0x275   :  { %1004 = vmatpush.msrb.mxu0 %v2478_v0  ;;  %1024 = vmatpush.msra.mxu1 %v2481_v9 }
 0x276   :  { %1044 = vmatpush.msra.mxu2 %v2484_v61  ;;  %1064 = vmatpush.msrb.mxu3 %v2487_v44 }
 0x2d2   :  { %v776_v53 = vpop.f32.mrf.mxu1  ;;  %v756_v24 = vpop.f32.mrf.mxu0 }
 0x2d3   :  { %v823_v32 = vrot.slane %v776_v53, 6 }
 0x2d5   :  { %v826_v0 = vsel %vm191_vm7, %v756_v24, %v823_v32 }
 0x2d9   :  { %v796_v29 = vpop.f32.mrf.mxu2  ;;  %v816_v5 = vpop.f32.mrf.mxu3 }
 0x2da   :  { %v824_v28 = vrot.slane %v796_v29, 4  ;;  %v825_v26 = vrot.slane %v816_v5, 2 }
 0x2dc   :  { %v827_v23 = vsel %vm193_vm2, %v824_v28, %v825_v26 }
 0x2dd   :  { %v828_v9 = vsel %vm195_vm5, %v826_v0, %v827_v23 }
 0x2de   :  { %v830_v21 = vadd.f32 %v828_v9, %v2851_v22 }
 0x2e0   :  { %v1495_v61 = vmul.f32 -1.442695, %v830_v21  ;;  %v851_v17 = vrot.slane %v830_v21, 6 }
 0x2e2   :  { %1535 = vpow2.f32 %v1495_v61 }
 0x2e8   :  { %v1536_v19 = vpop.eup %1535 }
 0x2e9   :  { %v834_v18 = vadd.f32 1.0, %v1536_v19 }
 0x2eb   :  { %1537 = vrcp.f32 %v834_v18  ;;  %v846_v29 = vand.u32 2147483648, %v834_v18  ;;  %v844_v15 = vand.u32 2147483647, %v834_v18  ;;  %vm840_vm9 = vweird.f32 %v834_v18 }
 0x2ec   :  { %1539 = vtanh.f32 %v851_v17  ;;  %v2854_v17 = vld [vmem:[#allocation12_spill] sm:$0xff] }
 0x2ed   :  { %v847_v23 = vor.u32 1.1754944e-38, %v846_v29  ;;  %vm845_vm11 = vcmp.eq.f32.partialorder %v844_v15, 8.507059e+37  ;;  %v2853_v15 = vld [vmem:[#allocation11_spill] sm:$0xff]  ;;  %v2858_v29 = vld [vmem:[#allocation14_spill] sm:$0xff] }
 0x2f1   :  { %v1538_v44 = vpop.eup %1537 }
 0x2f2   :  { %v836_v53 = vmul.f32 %v1538_v44, %v834_v18  ;;  %vm841_vm8 = vweird.f32 %v1538_v44  ;;  %v1540_v32 = vpop.eup %1539  ;;  %v2855_v18 = vld [vmem:[#allocation23_spill] sm:$0xff] }
 0x2f3   :  { %vm842_vm10 = vmor %vm840_vm9, %vm841_vm8 }
 0x2f4   :  { %v837_v16 = vsub.f32 1.0, %v836_v53  ;;  %v2857_v53 = vld [vmem:[#allocation13_spill] sm:$0xff] }
 0x2f6   :  { %v838_v5 = vmul.f32 %v1538_v44, %v837_v16 }
 0x2f8   :  { %v839_v24 = vadd.f32 %v1538_v44, %v838_v5  ;;  %v2859_v5 = vld [vmem:[#allocation27_spill] sm:$0xff] }
 0x2fa   :  { %v843_v26 = vsel %vm842_vm10, %v1538_v44, %v839_v24  ;;  %v2856_v44 = vld [vmem:[#allocation20_spill] sm:$0xff] }
 0x2fb   :  { %v848_v22 = vsel %vm845_vm11, %v847_v23, %v843_v26  ;;  %v2860_v24 = vld [vmem:[#allocation24_spill] sm:$0xff]  ;;  %v2861_v23 = vld [vmem:[#allocation15_spill] sm:$0xff] }
 0x2fc   :  { %v855_v28 = vrot.slane %v848_v22, 2  ;;  %v858_v0 = vmul.f32 %v1540_v32, %v848_v22  ;;  %v861_v16 = vrot.slane %v848_v22, 4  ;;  %v2862_v26 = vld [vmem:[#allocation16_spill] sm:$0xff]  ;;  %v2863_v22 = vld [vmem:[#allocation31_spill] sm:$0xff]  ;;  %v2865_v32 = vld [vmem:[#allocation18_spill] sm:$0xff] }
 0x2fe   :  { %v857_v19 = vmul.f32 %v855_v28, %v2333_v63  ;;  %v2852_v63 = vld [vmem:[#allocation17_spill] sm:$0xff]  ;;  %v2864_v28 = vld [vmem:[#allocation28_spill] sm:$0xff] }
 0x300   :  { %v2495_v9 = vadd.f32 %v858_v0, %v857_v19  ;;  %v2866_v19 = vld [vmem:[#allocation19_spill] sm:$0xff] }
 0x301   :  { %v2867_v0 = vld [vmem:[#allocation35_spill] sm:$0xff] }
 0x302   :  { %1541 = vtanh.f32 %v2495_v9 }
 0x308   :  { %v1542_v21 = vpop.eup %1541 }
 0x309   :  { %v863_v61 = vmul.f32 %v1542_v21, %v861_v16  ;;  %v2868_v16 = vld [vmem:[#allocation32_spill] sm:$0xff]  ;;  %v2869_v21 = vld [vmem:[#allocation21_spill] sm:$0xff] }
 0x30b   :  { %880 = vmatmul.f32.vlgmr.msra.gmra.mxu0 %v863_v61  ;;  %900 = vmatmul.f32.vlgmr.msrb.gmra.mxu1 %v863_v61 }
 0x30c   :  { %920 = vmatmul.f32.vlgmr.msrb.gmra.mxu2 %v863_v61  ;;  %940 = vmatmul.f32.vlgmr.msra.gmra.mxu3 %v863_v61  ;;  %v2870_v61 = vld [vmem:[#allocation22_spill] sm:$0xff] }
 0x30d   :  { %1114 = vmatpush.msra.mxu0 %v2226_v55  ;;  %1134 = vmatpush.msrb.mxu1 %v2229_v62 }
 0x30e   :  { %1154 = vmatpush.msrb.mxu2 %v2232_v48  ;;  %1174 = vmatpush.msra.mxu3 %v2235_v45 }
 0x30f   :  { %1115 = vmatpush.msra.mxu0 %v2238_v2  ;;  %1135 = vmatpush.msrb.mxu1 %v2241_v59 }
 0x310   :  { %1155 = vmatpush.msrb.mxu2 %v2244_v20  ;;  %1175 = vmatpush.msra.mxu3 %v2247_v60 }
 0x311   :  { %1116 = vmatpush.msra.mxu0 %v2344_v3  ;;  %1136 = vmatpush.msrb.mxu1 %v2251_v37 }
 0x312   :  { %1156 = vmatpush.msrb.mxu2 %v2254_v58  ;;  %1176 = vmatpush.msra.mxu3 %v2257_v41 }
 0x313   :  { %1117 = vmatpush.msra.mxu0 %v2350_v57  ;;  %1137 = vmatpush.msrb.mxu1 %v2353_v4 }
 0x314   :  { %1157 = vmatpush.msrb.mxu2 %v2262_v6  ;;  %1177 = vmatpush.msra.mxu3 %v2265_v25 }
 0x315   :  { %1118 = vmatpush.msra.mxu0 %v2358_v49  ;;  %1138 = vmatpush.msrb.mxu1 %v2361_v1 }
 0x316   :  { %1158 = vmatpush.msrb.mxu2 %v2270_v40  ;;  %1178 = vmatpush.msra.mxu3 %v2273_v52 }
 0x317   :  { %1119 = vmatpush.msra.mxu0 %v2366_v54  ;;  %1139 = vmatpush.msrb.mxu1 %v2369_v47 }
 0x318   :  { %1159 = vmatpush.msrb.mxu2 %v2278_v27  ;;  %1179 = vmatpush.msra.mxu3 %v2281_v30 }
 0x319   :  { %1120 = vmatpush.msra.mxu0 %v2374_v56  ;;  %1140 = vmatpush.msrb.mxu1 %v2377_v8 }
 0x31a   :  { %1160 = vmatpush.msrb.mxu2 %v2286_v31  ;;  %1180 = vmatpush.msra.mxu3 %v2381_v50 }
 0x31b   :  { %1121 = vmatpush.msra.mxu0 %v2384_v33  ;;  %1141 = vmatpush.msrb.mxu1 %v2387_v35 }
 0x31c   :  { %1161 = vmatpush.msrb.mxu2 %v2292_v34  ;;  %1181 = vmatpush.msra.mxu3 %v2391_v36 }
 0x31d   :  { %1122 = vmatpush.msra.mxu0 %v2394_v38  ;;  %1142 = vmatpush.msrb.mxu1 %v2397_v39 }
 0x31e   :  { %1162 = vmatpush.msrb.mxu2 %v2400_v42  ;;  %1182 = vmatpush.msra.mxu3 %v2403_v43 }
 0x31f   :  { %1123 = vmatpush.msra.mxu0 %v2406_v46  ;;  %1143 = vmatpush.msrb.mxu1 %v2409_v51 }
 0x320   :  { %1163 = vmatpush.msrb.mxu2 %v2412_v7  ;;  %1183 = vmatpush.msra.mxu3 %v2415_v10 }
 0x321   :  { %1124 = vmatpush.msra.mxu0 %v2418_v11  ;;  %1144 = vmatpush.msrb.mxu1 %v2421_v12 }
 0x322   :  { %1164 = vmatpush.msrb.mxu2 %v2424_v13  ;;  %1184 = vmatpush.msra.mxu3 %v2427_v14 }
 0x323   :  { %1125 = vmatpush.msra.mxu0 %v2852_v63  ;;  %1145 = vmatpush.msrb.mxu1 %v2853_v15 }
 0x324   :  { %1165 = vmatpush.msrb.mxu2 %v2854_v17  ;;  %1185 = vmatpush.msra.mxu3 %v2855_v18 }
 0x325   :  { %1126 = vmatpush.msra.mxu0 %v2856_v44  ;;  %1146 = vmatpush.msrb.mxu1 %v2857_v53 }
 0x326   :  { %1166 = vmatpush.msrb.mxu2 %v2858_v29  ;;  %1186 = vmatpush.msra.mxu3 %v2859_v5 }
 0x327   :  { %1127 = vmatpush.msra.mxu0 %v2860_v24  ;;  %1147 = vmatpush.msrb.mxu1 %v2861_v23  ;;  %v2871_v24 = vld [vmem:[#allocation37_spill] sm:$0xff] }
 0x328   :  { %1167 = vmatpush.msrb.mxu2 %v2862_v26  ;;  %1187 = vmatpush.msra.mxu3 %v2863_v22 }
 0x329   :  { %1128 = vmatpush.msra.mxu0 %v2864_v28  ;;  %1148 = vmatpush.msrb.mxu1 %v2865_v32 }
 0x32a   :  { %1168 = vmatpush.msrb.mxu2 %v2866_v19  ;;  %1188 = vmatpush.msra.mxu3 %v2867_v0 }
 0x32b   :  { %1129 = vmatpush.msra.mxu0 %v2868_v16  ;;  %1149 = vmatpush.msrb.mxu1 %v2869_v21  ;;  %v2872_v16 = vld [vmem:[#allocation43_spill] sm:$0xff] }
 0x32c   :  { %1169 = vmatpush.msrb.mxu2 %v2870_v61  ;;  %1189 = vmatpush.msra.mxu3 %v2871_v24 }
 0x388   :  { %v901_v23 = vpop.f32.mrf.mxu1  ;;  %v881_v53 = vpop.f32.mrf.mxu0 }
 0x389   :  { %v948_v26 = vrot.slane %v901_v23, 6 }
 0x38b   :  { %v951_v32 = vsel %vm191_vm7, %v881_v53, %v948_v26 }
 0x38f   :  { %v921_v5 = vpop.f32.mrf.mxu2  ;;  %v941_v22 = vpop.f32.mrf.mxu3 }
 0x390   :  { %v949_v29 = vrot.slane %v921_v5, 4  ;;  %v950_v28 = vrot.slane %v941_v22, 2 }
 0x392   :  { %v952_v19 = vsel %vm193_vm2, %v949_v29, %v950_v28 }
 0x393   :  { %v953_v0 = vsel %vm195_vm5, %v951_v32, %v952_v19 }
 0x394   :  { %v955_v44 = vadd.f32 %v953_v0, %v2872_v16 }
 0x396   :  { %v1496_v21 = vmul.f32 -1.442695, %v955_v44  ;;  %v976_v17 = vrot.slane %v955_v44, 6 }
 0x398   :  { %1543 = vpow2.f32 %v1496_v21 }
 0x39e   :  { %v1544_v61 = vpop.eup %1543 }
 0x39f   :  { %v959_v18 = vadd.f32 1.0, %v1544_v61 }
 0x3a1   :  { %1545 = vrcp.f32 %v959_v18  ;;  %v971_v5 = vand.u32 2147483648, %v959_v18  ;;  %v969_v63 = vand.u32 2147483647, %v959_v18  ;;  %vm965_vm13 = vweird.f32 %v959_v18 }
 0x3a2   :  { %1547 = vtanh.f32 %v976_v17 }
 0x3a3   :  { %v972_v29 = vor.u32 1.1754944e-38, %v971_v5  ;;  %vm970_vm15 = vcmp.eq.f32.partialorder %v969_v63, 8.507059e+37 }
 0x3a7   :  { %v1546_v24 = vpop.eup %1545 }
 0x3a8   :  { %v961_v23 = vmul.f32 %v1546_v24, %v959_v18  ;;  %vm966_vm12 = vweird.f32 %v1546_v24  ;;  %v1548_v19 = vpop.eup %1547 }
 0x3a9   :  { %vm967_vm14 = vmor %vm965_vm13, %vm966_vm12  ;;  %vm1407_vm12 = vcmask 261120   ;;  %vm1460_vm13 = vcmask 41984  }
 0x3aa   :  { %v962_v15 = vsub.f32 1.0, %v961_v23 }
 0x3ac   :  { %v963_v22 = vmul.f32 %v1546_v24, %v962_v15 }
 0x3ae   :  { %v964_v53 = vadd.f32 %v1546_v24, %v963_v22 }
 0x3b0   :  { %v968_v26 = vsel %vm967_vm14, %v1546_v24, %v964_v53 }
 0x3b1   :  { %v973_v28 = vsel %vm970_vm15, %v972_v29, %v968_v26 }
 0x3b2   :  { %v980_v32 = vrot.slane %v973_v28, 2  ;;  %v983_v16 = vmul.f32 %v1548_v19, %v973_v28  ;;  %v986_v15 = vrot.slane %v973_v28, 4 }
 0x3b4   :  { %v982_v0 = vmul.f32 %v980_v32, %v2495_v9 }
 0x3b6   :  { %v2567_v21 = vadd.f32 %v983_v16, %v982_v0 }
 0x3b8   :  { %1549 = vtanh.f32 %v2567_v21 }
 0x3be   :  { %v1550_v44 = vpop.eup %1549 }
 0x3bf   :  { %v988_v61 = vmul.f32 %v1550_v44, %v986_v15 }
 0x3c1   :  { %1005 = vmatmul.f32.vlgmr.msrb.gmra.mxu0 %v988_v61  ;;  %1025 = vmatmul.f32.vlgmr.msra.gmra.mxu1 %v988_v61 }
 0x3c2   :  { %1045 = vmatmul.f32.vlgmr.msra.gmra.mxu2 %v988_v61  ;;  %1065 = vmatmul.f32.vlgmr.msrb.gmra.mxu3 %v988_v61 }
 0x3c3   :  { %1239 = vmatpush.msrb.mxu0 %v2226_v55  ;;  %1259 = vmatpush.msra.mxu1 %v2229_v62  ;;  %v2873_v55 = vld [vmem:[#allocation17_spill] sm:$0xff]  ;;  %v2874_v62 = vld [vmem:[#allocation11_spill] sm:$0xff] }
 0x3c4   :  { %1279 = vmatpush.msra.mxu2 %v2232_v48  ;;  %1299 = vmatpush.msrb.mxu3 %v2235_v45  ;;  %v2875_v48 = vld [vmem:[#allocation12_spill] sm:$0xff]  ;;  %v2876_v45 = vld [vmem:[#allocation23_spill] sm:$0xff] }
 0x3c5   :  { %1240 = vmatpush.msrb.mxu0 %v2238_v2  ;;  %1260 = vmatpush.msra.mxu1 %v2241_v59  ;;  %v2877_v2 = vld [vmem:[#allocation20_spill] sm:$0xff]  ;;  %v2878_v59 = vld [vmem:[#allocation13_spill] sm:$0xff] }
 0x3c6   :  { %1280 = vmatpush.msra.mxu2 %v2244_v20  ;;  %1300 = vmatpush.msrb.mxu3 %v2247_v60  ;;  %v2879_v20 = vld [vmem:[#allocation14_spill] sm:$0xff]  ;;  %v2880_v60 = vld [vmem:[#allocation27_spill] sm:$0xff] }
 0x3c7   :  { %1241 = vmatpush.msrb.mxu0 %v2344_v3  ;;  %1261 = vmatpush.msra.mxu1 %v2251_v37  ;;  %v2881_v37 = vld [vmem:[#allocation24_spill] sm:$0xff]  ;;  %v2892_v3 = vld [vmem:[#allocation37_spill] sm:$0xff] }
 0x3c8   :  { %1281 = vmatpush.msra.mxu2 %v2254_v58  ;;  %1301 = vmatpush.msrb.mxu3 %v2257_v41  ;;  %v2882_v58 = vld [vmem:[#allocation15_spill] sm:$0xff]  ;;  %v2883_v41 = vld [vmem:[#allocation16_spill] sm:$0xff] }
 0x3c9   :  { %1242 = vmatpush.msrb.mxu0 %v2350_v57  ;;  %1262 = vmatpush.msra.mxu1 %v2353_v4 }
 0x3ca   :  { %1282 = vmatpush.msra.mxu2 %v2262_v6  ;;  %1302 = vmatpush.msrb.mxu3 %v2265_v25  ;;  %v2884_v6 = vld [vmem:[#allocation31_spill] sm:$0xff]  ;;  %v2885_v25 = vld [vmem:[#allocation28_spill] sm:$0xff] }
 0x3cb   :  { %1243 = vmatpush.msrb.mxu0 %v2358_v49  ;;  %1263 = vmatpush.msra.mxu1 %v2361_v1 }
 0x3cc   :  { %1283 = vmatpush.msra.mxu2 %v2270_v40  ;;  %1303 = vmatpush.msrb.mxu3 %v2273_v52  ;;  %v2886_v40 = vld [vmem:[#allocation18_spill] sm:$0xff]  ;;  %v2887_v52 = vld [vmem:[#allocation19_spill] sm:$0xff] }
 0x3cd   :  { %1244 = vmatpush.msrb.mxu0 %v2366_v54  ;;  %1264 = vmatpush.msra.mxu1 %v2369_v47 }
 0x3ce   :  { %1284 = vmatpush.msra.mxu2 %v2278_v27  ;;  %1304 = vmatpush.msrb.mxu3 %v2281_v30  ;;  %v2888_v27 = vld [vmem:[#allocation35_spill] sm:$0xff]  ;;  %v2889_v30 = vld [vmem:[#allocation32_spill] sm:$0xff] }
 0x3cf   :  { %1245 = vmatpush.msrb.mxu0 %v2374_v56  ;;  %1265 = vmatpush.msra.mxu1 %v2377_v8 }
 0x3d0   :  { %1285 = vmatpush.msra.mxu2 %v2286_v31  ;;  %1305 = vmatpush.msrb.mxu3 %v2381_v50  ;;  %v2890_v31 = vld [vmem:[#allocation21_spill] sm:$0xff] }
 0x3d1   :  { %1246 = vmatpush.msrb.mxu0 %v2384_v33  ;;  %1266 = vmatpush.msra.mxu1 %v2387_v35  ;;  %v2893_v35 = vld [vmem:[#allocation45_spill] sm:$0xff] }
 0x3d2   :  { %1286 = vmatpush.msra.mxu2 %v2292_v34  ;;  %1306 = vmatpush.msrb.mxu3 %v2391_v36  ;;  %v2891_v34 = vld [vmem:[#allocation22_spill] sm:$0xff] }
 0x3d3   :  { %1247 = vmatpush.msrb.mxu0 %v2394_v38  ;;  %1267 = vmatpush.msra.mxu1 %v2397_v39 }
 0x3d4   :  { %1287 = vmatpush.msra.mxu2 %v2400_v42  ;;  %1307 = vmatpush.msrb.mxu3 %v2403_v43 }
 0x3d5   :  { %1248 = vmatpush.msrb.mxu0 %v2406_v46  ;;  %1268 = vmatpush.msra.mxu1 %v2409_v51 }
 0x3d6   :  { %1288 = vmatpush.msra.mxu2 %v2412_v7  ;;  %1308 = vmatpush.msrb.mxu3 %v2415_v10 }
 0x3d7   :  { %1249 = vmatpush.msrb.mxu0 %v2418_v11  ;;  %1269 = vmatpush.msra.mxu1 %v2421_v12 }
 0x3d8   :  { %1289 = vmatpush.msra.mxu2 %v2424_v13  ;;  %1309 = vmatpush.msrb.mxu3 %v2427_v14 }
 0x3d9   :  { %1250 = vmatpush.msrb.mxu0 %v2873_v55  ;;  %1270 = vmatpush.msra.mxu1 %v2874_v62  ;;  %v2894_v55 = vld [vmem:[#allocation46_spill] sm:$0xff] }
 0x3da   :  { %1290 = vmatpush.msra.mxu2 %v2875_v48  ;;  %1310 = vmatpush.msrb.mxu3 %v2876_v45 }
 0x3db   :  { %1251 = vmatpush.msrb.mxu0 %v2877_v2  ;;  %1271 = vmatpush.msra.mxu1 %v2878_v59 }
 0x3dc   :  { %1291 = vmatpush.msra.mxu2 %v2879_v20  ;;  %1311 = vmatpush.msrb.mxu3 %v2880_v60 }
 0x3dd   :  { %1252 = vmatpush.msrb.mxu0 %v2881_v37  ;;  %1272 = vmatpush.msra.mxu1 %v2882_v58 }
 0x3de   :  { %1292 = vmatpush.msra.mxu2 %v2883_v41  ;;  %1312 = vmatpush.msrb.mxu3 %v2884_v6 }
 0x3df   :  { %1253 = vmatpush.msrb.mxu0 %v2885_v25  ;;  %1273 = vmatpush.msra.mxu1 %v2886_v40 }
 0x3e0   :  { %1293 = vmatpush.msra.mxu2 %v2887_v52  ;;  %1313 = vmatpush.msrb.mxu3 %v2888_v27 }
 0x3e1   :  { %1254 = vmatpush.msrb.mxu0 %v2889_v30  ;;  %1274 = vmatpush.msra.mxu1 %v2890_v31 }
 0x3e2   :  { %1294 = vmatpush.msra.mxu2 %v2891_v34  ;;  %1314 = vmatpush.msrb.mxu3 %v2892_v3 }
 0x43e   :  { %v1026_v57 = vpop.f32.mrf.mxu1  ;;  %v1006_v56 = vpop.f32.mrf.mxu0 }
 0x43f   :  { %v1073_v4 = vrot.slane %v1026_v57, 6 }
 0x441   :  { %v1076_v8 = vsel %vm191_vm7, %v1006_v56, %v1073_v4  ;;  %v1377_v56 = vld [vmem:[#allocation5 + $0x400] sm:$0xff] }
 0x445   :  { %v1046_v49 = vpop.f32.mrf.mxu2  ;;  %v1066_v1 = vpop.f32.mrf.mxu3 }
 0x446   :  { %v1074_v54 = vrot.slane %v1046_v49, 4  ;;  %v1075_v47 = vrot.slane %v1066_v1, 2 }
 0x448   :  { %v1077_v50 = vsel %vm193_vm2, %v1074_v54, %v1075_v47  ;;  %v1379_v54 = vld [vmem:[#allocation5 + $0x440] sm:$0xff] }
 0x449   :  { %v1078_v33 = vsel %vm195_vm5, %v1076_v8, %v1077_v50  ;;  %v1378_v47 = vld [vmem:[#allocation5 + $0x420] sm:$0xff] }
 0x44a   :  { %v1080_v36 = vadd.f32 %v1078_v33, %v2893_v35  ;;  %v1376_v8 = vld [vmem:[#allocation5 + $0x3e0] sm:$0xff] }
 0x44b   :  { %v1375_v50 = vld [vmem:[#allocation5 + $0x3c0] sm:$0xff] }
 0x44c   :  { %v1497_v38 = vmul.f32 -1.442695, %v1080_v36  ;;  %v1101_v51 = vrot.slane %v1080_v36, 6  ;;  %v1374_v33 = vld [vmem:[#allocation5 + $0x3a0] sm:$0xff] }
 0x44d   :  { %v1373_v36 = vld [vmem:[#allocation5 + $0x380] sm:$0xff] }
 0x44e   :  { %1551 = vpow2.f32 %v1497_v38  ;;  %v1372_v38 = vld [vmem:[#allocation5 + $0x360] sm:$0xff] }
 0x454   :  { %v1552_v39 = vpop.eup %1551 }
 0x455   :  { %v1084_v42 = vadd.f32 1.0, %v1552_v39 }
 0x457   :  { %1553 = vrcp.f32 %v1084_v42  ;;  %v1096_v10 = vand.u32 2147483648, %v1084_v42  ;;  %v1094_v12 = vand.u32 2147483647, %v1084_v42  ;;  %vm1090_vm1 = vweird.f32 %v1084_v42 }
 0x458   :  { %1555 = vtanh.f32 %v1101_v51 }
 0x459   :  { %v1097_v14 = vor.u32 1.1754944e-38, %v1096_v10  ;;  %vm1095_vm4 = vcmp.eq.f32.partialorder %v1094_v12, 8.507059e+37 }
 0x45d   :  { %v1554_v43 = vpop.eup %1553 }
 0x45e   :  { %v1086_v46 = vmul.f32 %v1554_v43, %v1084_v42  ;;  %vm1091_vm0 = vweird.f32 %v1554_v43  ;;  %v1556_v18 = vpop.eup %1555 }
 0x45f   :  { %vm1092_vm3 = vmor %vm1090_vm1, %vm1091_vm0 }
 0x460   :  { %v1087_v7 = vsub.f32 1.0, %v1086_v46  ;;  %v1371_v46 = vld [vmem:[#allocation5 + $0x340] sm:$0xff] }
 0x462   :  { %v1088_v11 = vmul.f32 %v1554_v43, %v1087_v7 }
 0x464   :  { %v1089_v13 = vadd.f32 %v1554_v43, %v1088_v11  ;;  %v1370_v11 = vld [vmem:[#allocation5 + $0x320] sm:$0xff] }
 0x466   :  { %v1093_v9 = vsel %vm1092_vm3, %v1554_v43, %v1089_v13 }
 0x467   :  { %v1098_v63 = vsel %vm1095_vm4, %v1097_v14, %v1093_v9  ;;  %v1369_v9 = vld [vmem:[#allocation5 + $0x300] sm:$0xff] }
 0x468   :  { %v1105_v17 = vrot.slane %v1098_v63, 2  ;;  %v1108_v23 = vmul.f32 %v1556_v18, %v1098_v63  ;;  %v1111_v22 = vrot.slane %v1098_v63, 4  ;;  %v2895_v63 = vld [vmem:[#allocation47_spill] sm:$0xff] }
 0x469   :  { %v1368_v18 = vld [vmem:[#allocation5 + $0x2e0] sm:$0xff] }
 0x46a   :  { %v1107_v24 = vmul.f32 %v1105_v17, %v2567_v21 }
 0x46c   :  { %v1109_v5 = vadd.f32 %v1108_v23, %v1107_v24  ;;  %v1367_v23 = vld [vmem:[#allocation5 + $0x2c0] sm:$0xff] }
 0x46e   :  { %1557 = vtanh.f32 %v1109_v5 }
 0x474   :  { %v1558_v53 = vpop.eup %1557 }
 0x475   :  { %v1113_v29 = vmul.f32 %v1558_v53, %v1111_v22  ;;  %v1365_v22 = vld [vmem:[#allocation5 + $0x280] sm:$0xff] }
 0x476   :  { %v1364_v53 = vld [vmem:[#allocation5 + $0x260] sm:$0xff] }
 0x477   :  { %1130 = vmatmul.f32.vlgmr.msra.gmra.mxu0 %v1113_v29  ;;  %1150 = vmatmul.f32.vlgmr.msrb.gmra.mxu1 %v1113_v29 }
 0x478   :  { %1170 = vmatmul.f32.vlgmr.msrb.gmra.mxu2 %v1113_v29  ;;  %1190 = vmatmul.f32.vlgmr.msra.gmra.mxu3 %v1113_v29 }
 0x479   :  { %1381 = vmatpush.msra.mxu0 %v1379_v54 }
 0x47b   :  { %1382 = vmatpush.msra.mxu0 %v1378_v47 }
 0x47d   :  { %1383 = vmatpush.msra.mxu0 %v1377_v56  ;;  %v1436_v56 = vld [vmem:[#allocation5 + $0x5a0] ss:$0 sm:$0xff] }
 0x47f   :  { %1384 = vmatpush.msra.mxu0 %v1376_v8 }
 0x481   :  { %1385 = vmatpush.msra.mxu0 %v1375_v50 }
 0x483   :  { %1386 = vmatpush.msra.mxu0 %v1374_v33 }
 0x485   :  { %1387 = vmatpush.msra.mxu0 %v1373_v36 }
 0x487   :  { %1388 = vmatpush.msra.mxu0 %v1372_v38 }
 0x489   :  { %1389 = vmatpush.msra.mxu0 %v1371_v46 }
 0x48b   :  { %1390 = vmatpush.msra.mxu0 %v1370_v11 }
 0x48d   :  { %1391 = vmatpush.msra.mxu0 %v1369_v9 }
 0x48f   :  { %1392 = vmatpush.msra.mxu0 %v1368_v18 }
 0x491   :  { %1393 = vmatpush.msra.mxu0 %v1367_v23 }
 0x4f4   :  { %v1151_v26 = vpop.f32.mrf.mxu1  ;;  %v1131_v15 = vpop.f32.mrf.mxu0 }
 0x4f5   :  { %v1198_v28 = vrot.slane %v1151_v26, 6 }
 0x4f7   :  { %v1201_v44 = vsel %vm191_vm7, %v1131_v15, %v1198_v28  ;;  %v1405_v28 = vld [vmem:[#allocation5 + $0x4e0] sm:$0xff] }
 0x4f8   :  { %1423 = vmatpush.msrb.mxu1 %v1405_v28 }
 0x4fb   :  { %v1171_v32 = vpop.f32.mrf.mxu2  ;;  %v1191_v19 = vpop.f32.mrf.mxu3 }
 0x4fc   :  { %v1199_v0 = vrot.slane %v1171_v32, 4  ;;  %v1200_v16 = vrot.slane %v1191_v19, 2  ;;  %v1404_v32 = vld [vmem:[#allocation5 + $0x4c0] sm:$0xff] }
 0x4fd   :  { %1424 = vmatpush.msrb.mxu1 %v1404_v32 }
 0x4fe   :  { %v1202_v21 = vsel %vm193_vm2, %v1199_v0, %v1200_v16 }
 0x4ff   :  { %v1203_v61 = vsel %vm195_vm5, %v1201_v44, %v1202_v21 }
 0x500   :  { %v1205_v62 = vadd.f32 %v1203_v61, %v2894_v55 }
 0x502   :  { %v1498_v48 = vmul.f32 -1.442695, %v1205_v62  ;;  %v1226_v60 = vrot.slane %v1205_v62, 6 }
 0x504   :  { %1559 = vpow2.f32 %v1498_v48 }
 0x50a   :  { %v1560_v45 = vpop.eup %1559 }
 0x50b   :  { %v1209_v2 = vadd.f32 1.0, %v1560_v45 }
 0x50d   :  { %1561 = vrcp.f32 %v1209_v2  ;;  %v1221_v58 = vand.u32 2147483648, %v1209_v2  ;;  %v1219_v6 = vand.u32 2147483647, %v1209_v2  ;;  %vm1215_vm8 = vweird.f32 %v1209_v2 }
 0x50e   :  { %1563 = vtanh.f32 %v1226_v60 }
 0x50f   :  { %v1222_v40 = vor.u32 1.1754944e-38, %v1221_v58  ;;  %vm1220_vm10 = vcmp.eq.f32.partialorder %v1219_v6, 8.507059e+37 }
 0x513   :  { %v1562_v59 = vpop.eup %1561 }
 0x514   :  { %v1211_v20 = vmul.f32 %v1562_v59, %v1209_v2  ;;  %vm1216_vm6 = vweird.f32 %v1562_v59  ;;  %v1564_v31 = vpop.eup %1563 }
 0x515   :  { %vm1217_vm9 = vmor %vm1215_vm8, %vm1216_vm6 }
 0x516   :  { %v1212_v37 = vsub.f32 1.0, %v1211_v20 }
 0x518   :  { %v1213_v41 = vmul.f32 %v1562_v59, %v1212_v37 }
 0x51a   :  { %v1214_v25 = vadd.f32 %v1562_v59, %v1213_v41 }
 0x51c   :  { %v1218_v52 = vsel %vm1217_vm9, %v1562_v59, %v1214_v25  ;;  %v1403_v25 = vld [vmem:[#allocation5 + $0x4a0] sm:$0xff] }
 0x51d   :  { %v1223_v27 = vsel %vm1220_vm10, %v1222_v40, %v1218_v52  ;;  %1425 = vmatpush.msrb.mxu1 %v1403_v25  ;;  %v1402_v40 = vld [vmem:[#allocation5 + $0x480] sm:$0xff] }
 0x51e   :  { %v1230_v30 = vrot.slane %v1223_v27, 2  ;;  %v1233_v3 = vmul.f32 %v1564_v31, %v1223_v27  ;;  %v1236_v4 = vrot.slane %v1223_v27, 4  ;;  %v1435_v52 = vld [vmem:[#allocation5 + $0x580] sm:$0xff] }
 0x51f   :  { %1426 = vmatpush.msrb.mxu1 %v1402_v40  ;;  %v1434_v27 = vld [vmem:[#allocation5 + $0x560] sm:$0xff]  ;;  %1452 = vmatpush.msrb.mxu2 %v1435_v52 }
 0x520   :  { %v1232_v34 = vmul.f32 %v1230_v30, %v1109_v5  ;;  %v1366_v5 = vld [vmem:[#allocation5 + $0x2a0] sm:$0xff] }
 0x521   :  { %1394 = vmatpush.msra.mxu0 %v1366_v5  ;;  %1453 = vmatpush.msrb.mxu2 %v1434_v27  ;;  %v1380_v30 = vld [vmem:[#allocation5 + $0x460] ss:$0 sm:$0xff] }
 0x522   :  { %v2643_v57 = vadd.f32 %v1233_v3, %v1232_v34 }
 0x523   :  { %1395 = vmatpush.msra.mxu0 %v1365_v22 }
 0x524   :  { %1565 = vtanh.f32 %v2643_v57 }
 0x525   :  { %1396 = vmatpush.msra.mxu0 %v1364_v53 }
 0x52a   :  { %v1566_v49 = vpop.eup %1565 }
 0x52b   :  { %v1238_v1 = vmul.f32 %v1566_v49, %v1236_v4  ;;  %v1432_v4 = vld [vmem:[#allocation5 + $0x520] sm:$0xff] }
 0x52c   :  { %v1406_v49 = vld [vmem:[#allocation5 + $0x500] ss:$0 sm:$0xff] }
 0x52d   :  { %1255 = vmatmul.f32.vlgmr.msrb.gmra.mxu0 %v1238_v1  ;;  %1275 = vmatmul.f32.vlgmr.msra.gmra.mxu1 %v1238_v1 }
 0x52e   :  { %1295 = vmatmul.f32.vlgmr.msra.gmra.mxu2 %v1238_v1  ;;  %1315 = vmatmul.f32.vlgmr.msrb.gmra.mxu3 %v1238_v1 }
 0x5aa   :  { %v1276_v35 = vpop.f32.mrf.mxu1  ;;  %v1256_v10 = vpop.f32.mrf.mxu0 }
 0x5ab   :  { %v1323_v39 = vrot.slane %v1276_v35, 6 }
 0x5ad   :  { %v1326_v12 = vsel %vm191_vm7, %v1256_v10, %v1323_v39 }
 0x5b1   :  { %v1296_v42 = vpop.f32.mrf.mxu2  ;;  %v1316_v43 = vpop.f32.mrf.mxu3 }
 0x5b2   :  { %v1324_v51 = vrot.slane %v1296_v42, 4  ;;  %v1325_v7 = vrot.slane %v1316_v43, 2 }
 0x5b4   :  { %v1327_v13 = vsel %vm193_vm2, %v1324_v51, %v1325_v7 }
 0x5b5   :  { %v1328_v14 = vsel %vm195_vm5, %v1326_v12, %v1327_v13 }
 0x5b6   :  { %v1330_v17 = vadd.f32 %v1328_v14, %v2895_v63 }
 0x5b8   :  { %v1499_v24 = vmul.f32 -1.442695, %v1330_v17  ;;  %v1351_v16 = vrot.slane %v1330_v17, 6 }
 0x5ba   :  { %1567 = vpow2.f32 %v1499_v24 }
 0x5c0   :  { %v1568_v29 = vpop.eup %1567 }
 0x5c1   :  { %v1334_v26 = vadd.f32 1.0, %v1568_v29 }
 0x5c3   :  { %1569 = vrcp.f32 %v1334_v26  ;;  %v1346_v44 = vand.u32 2147483648, %v1334_v26  ;;  %v1344_v61 = vand.u32 2147483647, %v1334_v26  ;;  %vm1340_vm5 = vweird.f32 %v1334_v26 }
 0x5c4   :  { %1571 = vtanh.f32 %v1351_v16 }
 0x5c5   :  { %v1347_v62 = vor.u32 1.1754944e-38, %v1346_v44  ;;  %vm1345_vm11 = vcmp.eq.f32.partialorder %v1344_v61, 8.507059e+37 }
 0x5c9   :  { %v1570_v19 = vpop.eup %1569 }
 0x5ca   :  { %v1336_v0 = vmul.f32 %v1570_v19, %v1334_v26  ;;  %vm1341_vm2 = vweird.f32 %v1570_v19  ;;  %v1572_v59 = vpop.eup %1571 }
 0x5cb   :  { %vm1342_vm7 = vmor %vm1340_vm5, %vm1341_vm2 }
 0x5cc   :  { %v1337_v15 = vsub.f32 1.0, %v1336_v0 }
 0x5ce   :  { %v1338_v21 = vmul.f32 %v1570_v19, %v1337_v15 }
 0x5d0   :  { %v1339_v55 = vadd.f32 %v1570_v19, %v1338_v21 }
 0x5d2   :  { %v1343_v48 = vsel %vm1342_vm7, %v1570_v19, %v1339_v55 }
 0x5d3   :  { %v1348_v45 = vsel %vm1345_vm11, %v1347_v62, %v1343_v48 }
 0x5d4   :  { %v1355_v2 = vrot.slane %v1348_v45, 2  ;;  %v1358_v60 = vmul.f32 %v1572_v59, %v1348_v45  ;;  %v1361_v58 = vrot.slane %v1348_v45, 4 }
 0x5d6   :  { %v1357_v20 = vmul.f32 %v1355_v2, %v2643_v57  ;;  %v1433_v57 = vld [vmem:[#allocation5 + $0x540] sm:$0xff] }
 0x5d7   :  { %1454 = vmatpush.msrb.mxu2 %v1433_v57 }
 0x5d8   :  { %v1359_v37 = vadd.f32 %v1358_v60, %v1357_v20 }
 0x5d9   :  { %1455 = vmatpush.msrb.mxu2 %v1432_v4 }
 0x5da   :  { %1573 = vtanh.f32 %v1359_v37 }
 0x5e0   :  { %v1574_v41 = vpop.eup %1573 }
 0x5e1   :  { %v1363_v6 = vmul.f32 %v1574_v41, %v1361_v58 }
 0x5e3   :  { %1397 = vmatmul.f32.vlgmr.msra.gmra.mxu0 %v1363_v6 }
 0x660   :  { %v1398_v31 = vpop.f32.mrf.mxu0 }
 0x661   :  { %v1399_v34 = vadd.f32 %v1398_v31, %v1380_v30 }
 0x663   :  { %v1401_v3 = vmax.f32 %v1399_v34, 0.0 }
 0x665   :  { %1500 = vmatmul.msk.f32.vlgmr.msrb.gmra.mxu1 %vm1407_vm12, %v1401_v3 }
 0x6e2   :  { %v1428_v1 = vpop.f32.mrf.mxu1 }
 0x6e3   :  { %v1429_v54 = vadd.f32 %v1428_v1, %v1406_v49 }
 0x6e5   :  { %v1431_v47 = vmax.f32 %v1429_v54, 0.0 }
 0x6e7   :  { %1501 = vmatmul.msk.f32.vlgmr.msrb.gmra.mxu2 %vm1407_vm12, %v1431_v47 }
 0x76a   :  { %v1457_v8 = vpop.f32.mrf.mxu2 }
 0x76b   :  { %v1458_v50 = vadd.f32 %v1457_v8, %v1436_v56 }
 0x76d   :  { %1461 = vst.msk [vmem:[#allocation7] sm:$0x3] %vm1460_vm13, %v1458_v50 }
 0x76e   :  { %1472 = dma.vmem_to_hbm [thread:$0]  %s1468_s1, 32, %s1470_s25, [#allocation4]  }
 0x76f   :  { %1715 = dma.done.wait [#allocation4], 32  }
 0x770   :  { %1716 = vsyncadd [#allocation4], 4294967264 }
 0x771   :  { %1477 = vsyncpa [#allocation3], 1 }
 0x772   :  { %1478 = vsyncpa [#allocation6], 1 }
 0x773   :  { %1479 = vsyncpa [#allocation4], 1 }

</bundles_post_ra>
